<compile_context>
chip_gen: v7x
topology: tpu7x:2x2x1
jax: 0.10.0
libtpu: 0.0.40
codegen_flags: <defaults>
</compile_context>

<pallas_src>
import functools

import jax
import jax.numpy as jnp
from jax.experimental import pallas as pl
from jax.experimental.pallas import tpu as pltpu


# --------------------------- Fused stack kernel ------------------------------

def decoder_stack_kernel(
    x_ref, kpm_ref, causal_ref,
    wqkv_ref, bqkv_ref, wo_ref, bo_ref,
    w1_ref, b1_ref, w2_ref, b2_ref,
    ln1_g_ref, ln1_b_ref, ln2_g_ref, ln2_b_ref,
    o_ref,
    *, num_heads, eps, S, BT,
):
    H = num_heads
    E = x_ref.shape[-1]
    D = E // H
    scale = 1.0 / (D ** 0.5)

    # Residual stream lives in the VMEM-resident output block for the whole
    # block stack; seed it from the input only on the first block.
    @pl.when(pl.program_id(1) == 0)
    def _():
        o_ref[...] = x_ref[...]

    x = o_ref[...]                                     # (BT*S, E) f32
    xb = x.astype(jnp.bfloat16)

    # ---- Fused QKV projection: one wide MXU pass, batch folded into M.
    qkv = jnp.dot(xb, wqkv_ref[0],
                  preferred_element_type=jnp.float32) + bqkv_ref[0]   # (BT*S, 3E)
    qkv_b = qkv.astype(jnp.bfloat16)

    causal = causal_ref[...]                           # (S, S) additive f32

    # ---- Head-batched self-attention per batch element (tiny static loop).
    ctx_rows = []
    for b in range(BT):
        rows = slice(b * S, (b + 1) * S)
        # (S, 3E) -> (3H, S, D): single transpose, heads become the batch dim.
        qkv3 = jnp.swapaxes(qkv_b[rows, :].reshape(S, 3 * H, D), 0, 1)
        q3 = qkv3[:H]                                  # (H, S, D) bf16
        k3 = qkv3[H:2 * H]
        v3 = qkv3[2 * H:]

        s = jnp.einsum('hqd,hkd->hqk', q3, k3,
                       preferred_element_type=jnp.float32) * scale    # (H, S, S)
        mask_b = causal + kpm_ref[b:b + 1, :]          # (S, S) additive
        s = s + mask_b[None, :, :]

        m = jnp.max(s, axis=-1, keepdims=True)
        p = jnp.exp(s - m)                             # f32
        l = jnp.sum(p, axis=-1, keepdims=True)         # (H, S, 1)

        ctx = jnp.einsum('hqk,hkd->hqd', p.astype(jnp.bfloat16), v3,
                         preferred_element_type=jnp.float32)          # (H, S, D)
        ctx = ctx / l                                  # exact softmax denominator
        ctx_rows.append(jnp.swapaxes(ctx, 0, 1).reshape(S, E))        # (S, E)

    attn = jnp.concatenate(ctx_rows, axis=0) if BT > 1 else ctx_rows[0]

    # ---- Output projection (M = BT*S rows).
    attn_out = jnp.dot(attn.astype(jnp.bfloat16), wo_ref[0],
                       preferred_element_type=jnp.float32) + bo_ref[0]

    # ---- Residual + LayerNorm 1 (f32 math).
    h1 = x + attn_out
    mu1 = jnp.mean(h1, axis=-1, keepdims=True)
    c1 = h1 - mu1
    v1 = jnp.mean(c1 * c1, axis=-1, keepdims=True)
    h1 = c1 * jax.lax.rsqrt(v1 + eps) * ln1_g_ref[0] + ln1_b_ref[0]

    # ---- Feed-forward: Linear -> ReLU -> Linear.
    f = jnp.dot(h1.astype(jnp.bfloat16), w1_ref[0],
                preferred_element_type=jnp.float32) + b1_ref[0]
    f = jnp.maximum(f, 0.0)
    f = jnp.dot(f.astype(jnp.bfloat16), w2_ref[0],
                preferred_element_type=jnp.float32) + b2_ref[0]

    # ---- Residual + LayerNorm 2.
    h2 = h1 + f
    mu2 = jnp.mean(h2, axis=-1, keepdims=True)
    c2 = h2 - mu2
    v2 = jnp.mean(c2 * c2, axis=-1, keepdims=True)
    h2 = c2 * jax.lax.rsqrt(v2 + eps) * ln2_g_ref[0] + ln2_b_ref[0]

    # Stays in VMEM across blocks; DMA'd to HBM only when the batch tile ends.
    o_ref[...] = h2.astype(o_ref.dtype)


# ------------------------------ Wrapper --------------------------------------

def decoder_stack(x2, kpm_add, causal_add, params, *, num_heads, eps=1e-5,
                  batch_tile=None):
    BS, E = x2.shape
    B, S = kpm_add.shape
    L = params["wqkv"].shape[0]
    BT = B if batch_tile is None else batch_tile
    G = B // BT

    weight_order = ("wqkv", "bqkv", "wo", "bo", "w1", "b1", "w2", "b2",
                    "ln1_g", "ln1_b", "ln2_g", "ln2_b")
    weights = [params[k] for k in weight_order]

    def wspec(arr):
        # Per-block weight: leading dim indexed by the block grid coordinate.
        return pl.BlockSpec((1,) + arr.shape[1:],
                            lambda g, l, _nd=arr.ndim: (l,) + (0,) * (_nd - 1))

    kernel = functools.partial(decoder_stack_kernel,
                               num_heads=num_heads, eps=eps, S=S, BT=BT)

    return pl.pallas_call(
        kernel,
        out_shape=jax.ShapeDtypeStruct((BS, E), jnp.float32),
        grid=(G, L),                                   # batch tiles outer, blocks inner
        in_specs=[
            pl.BlockSpec((BT * S, E), lambda g, l: (g, 0)),   # x (fetched once per tile)
            pl.BlockSpec((BT, S),     lambda g, l: (g, 0)),   # key-padding additive mask
            pl.BlockSpec((S, S),      lambda g, l: (0, 0)),   # causal additive mask
        ] + [wspec(w) for w in weights],
        # Constant across the block axis -> residual stream resident in VMEM.
        out_specs=pl.BlockSpec((BT * S, E), lambda g, l: (g, 0)),
        compiler_params=pltpu.CompilerParams(
            dimension_semantics=("parallel", "arbitrary"),    # megacore over batch on v7x
            vmem_limit_bytes=32 * 1024 * 1024,                # budget explicitly (v7x: 64 MiB phys)
        ),
    )(x2, kpm_add, causal_add, *weights)


def init_decoder_params(key, embed_dim, num_blocks, ff_dim):
    s = 0.02
    keys = jax.random.split(key, 4 * num_blocks)

    def nrm(k, shape):
        return (jax.random.normal(k, shape, jnp.float32) * s).astype(jnp.bfloat16)

    wqkv = jnp.stack([nrm(keys[4 * i + 0], (embed_dim, 3 * embed_dim))
                      for i in range(num_blocks)])
    wo = jnp.stack([nrm(keys[4 * i + 1], (embed_dim, embed_dim))
                    for i in range(num_blocks)])
    w1 = jnp.stack([nrm(keys[4 * i + 2], (embed_dim, ff_dim))
                    for i in range(num_blocks)])
    w2 = jnp.stack([nrm(keys[4 * i + 3], (ff_dim, embed_dim))
                    for i in range(num_blocks)])
    zeros = lambda n: jnp.zeros((num_blocks, 1, n), jnp.float32)
    ones = lambda n: jnp.ones((num_blocks, 1, n), jnp.float32)
    return {
        "wqkv": wqkv, "bqkv": zeros(3 * embed_dim),
        "wo": wo, "bo": zeros(embed_dim),
        "w1": w1, "b1": zeros(ff_dim),
        "w2": w2, "b2": zeros(embed_dim),
        "ln1_g": ones(embed_dim), "ln1_b": zeros(embed_dim),
        "ln2_g": ones(embed_dim), "ln2_b": zeros(embed_dim),
    }


def decoder_forward(sequence, key_padding_mask, causal_mask, params, num_heads):
    B, S, E = sequence.shape
    neg = jnp.float32(-1e9)
    kpm_add = jnp.where(key_padding_mask, neg, 0.0).astype(jnp.float32)   # (B, S)
    causal_add = jnp.where(causal_mask, neg, 0.0).astype(jnp.float32)     # (S, S)
    x2 = sequence.reshape(B * S, E).astype(jnp.float32)
    out = decoder_stack(x2, kpm_add, causal_add, params, num_heads=num_heads)
    return out.reshape(B, S, E)


# --------------------------------- Main --------------------------------------

if __name__ == "__main__":
    B, S, E = 2, 8, 32
    num_heads = 4
    ff_dim = 64
    num_blocks = 2
    dropout_rate = 0.1  # unused at inference

    key = jax.random.PRNGKey(0)
    k_x, k_p = jax.random.split(key)

    sequence = jax.random.normal(k_x, (B, S, E), jnp.float32)
    # key_padding_mask: True = padded. Pad last 2 positions of batch element 1.
    key_padding_mask = jnp.zeros((B, S), dtype=bool).at[1, -2:].set(True)
    # causal_mask: True above the diagonal (future positions masked).
    causal_mask = jnp.triu(jnp.ones((S, S), dtype=bool), k=1)

    params = init_decoder_params(k_p, E, num_blocks, ff_dim)

    fwd = jax.jit(functools.partial(decoder_forward, num_heads=num_heads))
    out = fwd(sequence, key_padding_mask, causal_mask, params)
    out = jax.block_until_ready(out)

    assert out.shape == (B, S, E)
    assert bool(jnp.all(jnp.isfinite(out)))
    print("KERNEL_OK")
</pallas_src>

<mosaic_0001>
module attributes {stable_mosaic.version = 11 : i64} {
  func.func @decoder_stack_kernel(%arg0: i32, %arg1: i32, %arg2: memref<16x32xf32, #tpu.memory_space<vmem>>, %arg3: memref<2x8xf32, #tpu.memory_space<vmem>>, %arg4: memref<8x8xf32, #tpu.memory_space<vmem>>, %arg5: memref<1x32x96xbf16, #tpu.memory_space<vmem>>, %arg6: memref<1x1x96xf32, #tpu.memory_space<vmem>>, %arg7: memref<1x32x32xbf16, #tpu.memory_space<vmem>>, %arg8: memref<1x1x32xf32, #tpu.memory_space<vmem>>, %arg9: memref<1x32x64xbf16, #tpu.memory_space<vmem>>, %arg10: memref<1x1x64xf32, #tpu.memory_space<vmem>>, %arg11: memref<1x64x32xbf16, #tpu.memory_space<vmem>>, %arg12: memref<1x1x32xf32, #tpu.memory_space<vmem>>, %arg13: memref<1x1x32xf32, #tpu.memory_space<vmem>>, %arg14: memref<1x1x32xf32, #tpu.memory_space<vmem>>, %arg15: memref<1x1x32xf32, #tpu.memory_space<vmem>>, %arg16: memref<1x1x32xf32, #tpu.memory_space<vmem>>, %arg17: memref<16x32xf32, #tpu.memory_space<vmem>>) attributes {dimension_semantics = [#tpu.dimension_semantics<parallel>, #tpu.dimension_semantics<arbitrary>], iteration_bounds = array<i64: 1, 2>, scalar_prefetch = 0 : i64, scratch_operands = 0 : i64, tpu.core_type = #tpu.core_type<tc>, window_params = [{transform_indices = @transform_0, window_bounds = array<i64: 16, 32>}, {transform_indices = @transform_1, window_bounds = array<i64: 2, 8>}, {pipeline_mode = #tpu.pipeline_mode<synchronous>, transform_indices = @transform_2, window_bounds = array<i64: 8, 8>}, {transform_indices = @transform_3, window_bounds = array<i64: 1, 32, 96>}, {transform_indices = @transform_4, window_bounds = array<i64: 1, 1, 96>}, {transform_indices = @transform_5, window_bounds = array<i64: 1, 32, 32>}, {transform_indices = @transform_6, window_bounds = array<i64: 1, 1, 32>}, {transform_indices = @transform_7, window_bounds = array<i64: 1, 32, 64>}, {transform_indices = @transform_8, window_bounds = array<i64: 1, 1, 64>}, {transform_indices = @transform_9, window_bounds = array<i64: 1, 64, 32>}, {transform_indices = @transform_10, window_bounds = array<i64: 1, 1, 32>}, {transform_indices = @transform_11, window_bounds = array<i64: 1, 1, 32>}, {transform_indices = @transform_12, window_bounds = array<i64: 1, 1, 32>}, {transform_indices = @transform_13, window_bounds = array<i64: 1, 1, 32>}, {transform_indices = @transform_14, window_bounds = array<i64: 1, 1, 32>}, {transform_indices = @transform_15, window_bounds = array<i64: 16, 32>}]} {
    %c0_i32 = arith.constant 0 : i32
    %0 = arith.cmpi eq, %arg1, %c0_i32 : i32
    %1 = arith.extui %0 : i1 to i32
    %c0_i32_0 = arith.constant 0 : i32
    %2 = arith.cmpi ne, %1, %c0_i32_0 : i32
    scf.if %2 {
      %c0_69 = arith.constant 0 : index
      %c0_70 = arith.constant 0 : index
      %148 = vector.load %arg2[%c0_69, %c0_70] : memref<16x32xf32, #tpu.memory_space<vmem>>, vector<16x32xf32>
      %c0_71 = arith.constant 0 : index
      %c0_72 = arith.constant 0 : index
      %149 = vector.load %arg17[%c0_71, %c0_72] : memref<16x32xf32, #tpu.memory_space<vmem>>, vector<16x32xf32>
      tpu.vector_store %arg17[%c0_71, %c0_72], %148 {strides = array<i32>} : memref<16x32xf32, #tpu.memory_space<vmem>>, vector<16x32xf32>,
    } else {
    }
    %c0 = arith.constant 0 : index
    %c0_1 = arith.constant 0 : index
    %3 = vector.load %arg17[%c0, %c0_1] : memref<16x32xf32, #tpu.memory_space<vmem>>, vector<16x32xf32>
    %4 = arith.truncf %3 : vector<16x32xf32> to vector<16x32xbf16>
    %c0_2 = arith.constant 0 : index
    %c0_3 = arith.constant 0 : index
    %c0_4 = arith.constant 0 : index
    %5 = vector.load %arg5[%c0_2, %c0_3, %c0_4] : memref<1x32x96xbf16, #tpu.memory_space<vmem>>, vector<1x32x96xbf16>
    %6 = vector.shape_cast %5 : vector<1x32x96xbf16> to vector<32x96xbf16>
    %cst = arith.constant dense<0.000000e+00> : vector<16x96xf32>
    %7 = tpu.matmul %4, %6, %cst {dimension_numbers = #tpu.dot_dimension_numbers<[1], [0], [0], [1], [0, 0, 1, 1], [], []>} : vector<16x32xbf16>, vector<32x96xbf16>, vector<16x96xf32> -> vector<16x96xf32>
    %c0_5 = arith.constant 0 : index
    %c0_6 = arith.constant 0 : index
    %c0_7 = arith.constant 0 : index
    %8 = vector.load %arg6[%c0_5, %c0_6, %c0_7] : memref<1x1x96xf32, #tpu.memory_space<vmem>>, vector<1x1x96xf32>
    %9 = vector.shape_cast %8 : vector<1x1x96xf32> to vector<1x96xf32>
    %10 = vector.broadcast %9 : vector<1x96xf32> to vector<16x96xf32>
    %11 = arith.addf %7, %10 : vector<16x96xf32>
    %12 = arith.truncf %11 : vector<16x96xf32> to vector<16x96xbf16>
    %c0_8 = arith.constant 0 : index
    %c0_9 = arith.constant 0 : index
    %13 = vector.load %arg4[%c0_8, %c0_9] : memref<8x8xf32, #tpu.memory_space<vmem>>, vector<8x8xf32>
    %14 = vector.extract_strided_slice %12 {offsets = [0, 0], sizes = [8, 96], strides = [1, 1]} : vector<16x96xbf16> to vector<8x96xbf16>
    %15 = vector.shape_cast %14 : vector<8x96xbf16> to vector<8x12x8xbf16>
    %16 = tpu.transpose %15, [1, 0, 2] : vector<8x12x8xbf16> -> vector<12x8x8xbf16>
    %17 = vector.extract_strided_slice %16 {offsets = [0, 0, 0], sizes = [4, 8, 8], strides = [1, 1, 1]} : vector<12x8x8xbf16> to vector<4x8x8xbf16>
    %18 = vector.extract_strided_slice %16 {offsets = [4, 0, 0], sizes = [4, 8, 8], strides = [1, 1, 1]} : vector<12x8x8xbf16> to vector<4x8x8xbf16>
    %19 = vector.extract_strided_slice %16 {offsets = [8, 0, 0], sizes = [4, 8, 8], strides = [1, 1, 1]} : vector<12x8x8xbf16> to vector<4x8x8xbf16>
    "tpu.trace_start"() <{level = 10 : i32, message = "hqd,hkd->hqk"}> : () -> ()
    %cst_10 = arith.constant dense<0.000000e+00> : vector<4x8x8xf32>
    %20 = tpu.matmul %17, %18, %cst_10 {dimension_numbers = #tpu.dot_dimension_numbers<[2], [2], [1], [1], [0, 0, 0, 1, 1, 1], [0], [0]>} : vector<4x8x8xbf16>, vector<4x8x8xbf16>, vector<4x8x8xf32> -> vector<4x8x8xf32>
    "tpu.trace_stop"() : () -> ()
    %cst_11 = arith.constant 0.353553385 : f32
    %21 = vector.broadcast %cst_11 : f32 to vector<4x8x8xf32>
    %22 = arith.mulf %20, %21 : vector<4x8x8xf32>
    %c0_12 = arith.constant 0 : index
    %c0_13 = arith.constant 0 : index
    %23 = vector.load %arg3[%c0_12, %c0_13] : memref<2x8xf32, #tpu.memory_space<vmem>>, vector<1x8xf32>
    %24 = vector.broadcast %23 : vector<1x8xf32> to vector<8x8xf32>
    %25 = arith.addf %13, %24 : vector<8x8xf32>
    %26 = vector.shape_cast %25 : vector<8x8xf32> to vector<1x8x8xf32>
    %27 = vector.broadcast %26 : vector<1x8x8xf32> to vector<4x8x8xf32>
    %28 = arith.addf %22, %27 : vector<4x8x8xf32>
    %cst_14 = arith.constant dense<0xFF800000> : vector<4x8xf32>
    %29 = vector.multi_reduction <maximumf>, %28, %cst_14 [2] : vector<4x8x8xf32> to vector<4x8xf32>
    %30 = vector.shape_cast %29 : vector<4x8xf32> to vector<4x8x1xf32>
    %31 = vector.broadcast %30 : vector<4x8x1xf32> to vector<4x8x8xf32>
    %32 = arith.subf %28, %31 : vector<4x8x8xf32>
    %33 = math.exp %32 : vector<4x8x8xf32>
    %cst_15 = arith.constant dense<0.000000e+00> : vector<4x8xf32>
    %34 = vector.multi_reduction <add>, %33, %cst_15 [2] : vector<4x8x8xf32> to vector<4x8xf32>
    %35 = vector.shape_cast %34 : vector<4x8xf32> to vector<4x8x1xf32>
    %36 = arith.truncf %33 : vector<4x8x8xf32> to vector<4x8x8xbf16>
    "tpu.trace_start"() <{level = 10 : i32, message = "hqk,hkd->hqd"}> : () -> ()
    %cst_16 = arith.constant dense<0.000000e+00> : vector<4x8x8xf32>
    %37 = tpu.matmul %36, %19, %cst_16 {dimension_numbers = #tpu.dot_dimension_numbers<[2], [1], [1], [2], [0, 0, 0, 1, 1, 2], [0], [0]>} : vector<4x8x8xbf16>, vector<4x8x8xbf16>, vector<4x8x8xf32> -> vector<4x8x8xf32>
    "tpu.trace_stop"() : () -> ()
    %38 = vector.broadcast %35 : vector<4x8x1xf32> to vector<4x8x8xf32>
    %39 = arith.divf %37, %38 : vector<4x8x8xf32>
    %40 = tpu.transpose %39, [1, 0, 2] : vector<4x8x8xf32> -> vector<8x4x8xf32>
    %41 = vector.shape_cast %40 : vector<8x4x8xf32> to vector<8x32xf32>
    %42 = vector.extract_strided_slice %12 {offsets = [8, 0], sizes = [8, 96], strides = [1, 1]} : vector<16x96xbf16> to vector<8x96xbf16>
    %43 = vector.shape_cast %42 : vector<8x96xbf16> to vector<8x12x8xbf16>
    %44 = tpu.transpose %43, [1, 0, 2] : vector<8x12x8xbf16> -> vector<12x8x8xbf16>
    %45 = vector.extract_strided_slice %44 {offsets = [0, 0, 0], sizes = [4, 8, 8], strides = [1, 1, 1]} : vector<12x8x8xbf16> to vector<4x8x8xbf16>
    %46 = vector.extract_strided_slice %44 {offsets = [4, 0, 0], sizes = [4, 8, 8], strides = [1, 1, 1]} : vector<12x8x8xbf16> to vector<4x8x8xbf16>
    %47 = vector.extract_strided_slice %44 {offsets = [8, 0, 0], sizes = [4, 8, 8], strides = [1, 1, 1]} : vector<12x8x8xbf16> to vector<4x8x8xbf16>
    "tpu.trace_start"() <{level = 10 : i32, message = "hqd,hkd->hqk"}> : () -> ()
    %cst_17 = arith.constant dense<0.000000e+00> : vector<4x8x8xf32>
    %48 = tpu.matmul %45, %46, %cst_17 {dimension_numbers = #tpu.dot_dimension_numbers<[2], [2], [1], [1], [0, 0, 0, 1, 1, 1], [0], [0]>} : vector<4x8x8xbf16>, vector<4x8x8xbf16>, vector<4x8x8xf32> -> vector<4x8x8xf32>
    "tpu.trace_stop"() : () -> ()
    %cst_18 = arith.constant 0.353553385 : f32
    %49 = vector.broadcast %cst_18 : f32 to vector<4x8x8xf32>
    %50 = arith.mulf %48, %49 : vector<4x8x8xf32>
    %c1 = arith.constant 1 : index
    %c0_19 = arith.constant 0 : index
    %51 = vector.load %arg3[%c1, %c0_19] : memref<2x8xf32, #tpu.memory_space<vmem>>, vector<1x8xf32>
    %52 = vector.broadcast %51 : vector<1x8xf32> to vector<8x8xf32>
    %53 = arith.addf %13, %52 : vector<8x8xf32>
    %54 = vector.shape_cast %53 : vector<8x8xf32> to vector<1x8x8xf32>
    %55 = vector.broadcast %54 : vector<1x8x8xf32> to vector<4x8x8xf32>
    %56 = arith.addf %50, %55 : vector<4x8x8xf32>
    %cst_20 = arith.constant dense<0xFF800000> : vector<4x8xf32>
    %57 = vector.multi_reduction <maximumf>, %56, %cst_20 [2] : vector<4x8x8xf32> to vector<4x8xf32>
    %58 = vector.shape_cast %57 : vector<4x8xf32> to vector<4x8x1xf32>
    %59 = vector.broadcast %58 : vector<4x8x1xf32> to vector<4x8x8xf32>
    %60 = arith.subf %56, %59 : vector<4x8x8xf32>
    %61 = math.exp %60 : vector<4x8x8xf32>
    %cst_21 = arith.constant dense<0.000000e+00> : vector<4x8xf32>
    %62 = vector.multi_reduction <add>, %61, %cst_21 [2] : vector<4x8x8xf32> to vector<4x8xf32>
    %63 = vector.shape_cast %62 : vector<4x8xf32> to vector<4x8x1xf32>
    %64 = arith.truncf %61 : vector<4x8x8xf32> to vector<4x8x8xbf16>
    "tpu.trace_start"() <{level = 10 : i32, message = "hqk,hkd->hqd"}> : () -> ()
    %cst_22 = arith.constant dense<0.000000e+00> : vector<4x8x8xf32>
    %65 = tpu.matmul %64, %47, %cst_22 {dimension_numbers = #tpu.dot_dimension_numbers<[2], [1], [1], [2], [0, 0, 0, 1, 1, 2], [0], [0]>} : vector<4x8x8xbf16>, vector<4x8x8xbf16>, vector<4x8x8xf32> -> vector<4x8x8xf32>
    "tpu.trace_stop"() : () -> ()
    %66 = vector.broadcast %63 : vector<4x8x1xf32> to vector<4x8x8xf32>
    %67 = arith.divf %65, %66 : vector<4x8x8xf32>
    %68 = tpu.transpose %67, [1, 0, 2] : vector<4x8x8xf32> -> vector<8x4x8xf32>
    %69 = vector.shape_cast %68 : vector<8x4x8xf32> to vector<8x32xf32>
    %70 = tpu.concatenate %41, %69 in 0 : vector<8x32xf32>, vector<8x32xf32> -> vector<16x32xf32>
    %71 = arith.truncf %70 : vector<16x32xf32> to vector<16x32xbf16>
    %c0_23 = arith.constant 0 : index
    %c0_24 = arith.constant 0 : index
    %c0_25 = arith.constant 0 : index
    %72 = vector.load %arg7[%c0_23, %c0_24, %c0_25] : memref<1x32x32xbf16, #tpu.memory_space<vmem>>, vector<1x32x32xbf16>
    %73 = vector.shape_cast %72 : vector<1x32x32xbf16> to vector<32x32xbf16>
    %cst_26 = arith.constant dense<0.000000e+00> : vector<16x32xf32>
    %74 = tpu.matmul %71, %73, %cst_26 {dimension_numbers = #tpu.dot_dimension_numbers<[1], [0], [0], [1], [0, 0, 1, 1], [], []>} : vector<16x32xbf16>, vector<32x32xbf16>, vector<16x32xf32> -> vector<16x32xf32>
    %c0_27 = arith.constant 0 : index
    %c0_28 = arith.constant 0 : index
    %c0_29 = arith.constant 0 : index
    %75 = vector.load %arg8[%c0_27, %c0_28, %c0_29] : memref<1x1x32xf32, #tpu.memory_space<vmem>>, vector<1x1x32xf32>
    %76 = vector.shape_cast %75 : vector<1x1x32xf32> to vector<1x32xf32>
    %77 = vector.broadcast %76 : vector<1x32xf32> to vector<16x32xf32>
    %78 = arith.addf %74, %77 : vector<16x32xf32>
    %79 = arith.addf %3, %78 : vector<16x32xf32>
    %cst_30 = arith.constant dense<0.000000e+00> : vector<16xf32>
    %80 = vector.multi_reduction <add>, %79, %cst_30 [1] : vector<16x32xf32> to vector<16xf32>
    %81 = vector.shape_cast %80 : vector<16xf32> to vector<16x1xf32>
    %cst_31 = arith.constant 3.200000e+01 : f32
    %82 = vector.broadcast %cst_31 : f32 to vector<16x1xf32>
    %83 = arith.divf %81, %82 : vector<16x1xf32>
    %84 = vector.broadcast %83 : vector<16x1xf32> to vector<16x32xf32>
    %85 = arith.subf %79, %84 : vector<16x32xf32>
    %86 = arith.mulf %85, %85 : vector<16x32xf32>
    %cst_32 = arith.constant dense<0.000000e+00> : vector<16xf32>
    %87 = vector.multi_reduction <add>, %86, %cst_32 [1] : vector<16x32xf32> to vector<16xf32>
    %88 = vector.shape_cast %87 : vector<16xf32> to vector<16x1xf32>
    %cst_33 = arith.constant 3.200000e+01 : f32
    %89 = vector.broadcast %cst_33 : f32 to vector<16x1xf32>
    %90 = arith.divf %88, %89 : vector<16x1xf32>
    %cst_34 = arith.constant 9.99999974E-6 : f32
    %91 = vector.broadcast %cst_34 : f32 to vector<16x1xf32>
    %92 = arith.addf %90, %91 : vector<16x1xf32>
    %93 = math.rsqrt %92 : vector<16x1xf32>
    %94 = vector.broadcast %93 : vector<16x1xf32> to vector<16x32xf32>
    %95 = arith.mulf %85, %94 : vector<16x32xf32>
    %c0_35 = arith.constant 0 : index
    %c0_36 = arith.constant 0 : index
    %c0_37 = arith.constant 0 : index
    %96 = vector.load %arg13[%c0_35, %c0_36, %c0_37] : memref<1x1x32xf32, #tpu.memory_space<vmem>>, vector<1x1x32xf32>
    %97 = vector.shape_cast %96 : vector<1x1x32xf32> to vector<1x32xf32>
    %98 = vector.broadcast %97 : vector<1x32xf32> to vector<16x32xf32>
    %99 = arith.mulf %95, %98 : vector<16x32xf32>
    %c0_38 = arith.constant 0 : index
    %c0_39 = arith.constant 0 : index
    %c0_40 = arith.constant 0 : index
    %100 = vector.load %arg14[%c0_38, %c0_39, %c0_40] : memref<1x1x32xf32, #tpu.memory_space<vmem>>, vector<1x1x32xf32>
    %101 = vector.shape_cast %100 : vector<1x1x32xf32> to vector<1x32xf32>
    %102 = vector.broadcast %101 : vector<1x32xf32> to vector<16x32xf32>
    %103 = arith.addf %99, %102 : vector<16x32xf32>
    %104 = arith.truncf %103 : vector<16x32xf32> to vector<16x32xbf16>
    %c0_41 = arith.constant 0 : index
    %c0_42 = arith.constant 0 : index
    %c0_43 = arith.constant 0 : index
    %105 = vector.load %arg9[%c0_41, %c0_42, %c0_43] : memref<1x32x64xbf16, #tpu.memory_space<vmem>>, vector<1x32x64xbf16>
    %106 = vector.shape_cast %105 : vector<1x32x64xbf16> to vector<32x64xbf16>
    %cst_44 = arith.constant dense<0.000000e+00> : vector<16x64xf32>
    %107 = tpu.matmul %104, %106, %cst_44 {dimension_numbers = #tpu.dot_dimension_numbers<[1], [0], [0], [1], [0, 0, 1, 1], [], []>} : vector<16x32xbf16>, vector<32x64xbf16>, vector<16x64xf32> -> vector<16x64xf32>
    %c0_45 = arith.constant 0 : index
    %c0_46 = arith.constant 0 : index
    %c0_47 = arith.constant 0 : index
    %108 = vector.load %arg10[%c0_45, %c0_46, %c0_47] : memref<1x1x64xf32, #tpu.memory_space<vmem>>, vector<1x1x64xf32>
    %109 = vector.shape_cast %108 : vector<1x1x64xf32> to vector<1x64xf32>
    %110 = vector.broadcast %109 : vector<1x64xf32> to vector<16x64xf32>
    %111 = arith.addf %107, %110 : vector<16x64xf32>
    %cst_48 = arith.constant 0.000000e+00 : f32
    %112 = vector.broadcast %cst_48 : f32 to vector<16x64xf32>
    %113 = arith.maximumf %111, %112 : vector<16x64xf32>
    %114 = arith.truncf %113 : vector<16x64xf32> to vector<16x64xbf16>
    %c0_49 = arith.constant 0 : index
    %c0_50 = arith.constant 0 : index
    %c0_51 = arith.constant 0 : index
    %115 = vector.load %arg11[%c0_49, %c0_50, %c0_51] : memref<1x64x32xbf16, #tpu.memory_space<vmem>>, vector<1x64x32xbf16>
    %116 = vector.shape_cast %115 : vector<1x64x32xbf16> to vector<64x32xbf16>
    %cst_52 = arith.constant dense<0.000000e+00> : vector<16x32xf32>
    %117 = tpu.matmul %114, %116, %cst_52 {dimension_numbers = #tpu.dot_dimension_numbers<[1], [0], [0], [1], [0, 0, 1, 1], [], []>} : vector<16x64xbf16>, vector<64x32xbf16>, vector<16x32xf32> -> vector<16x32xf32>
    %c0_53 = arith.constant 0 : index
    %c0_54 = arith.constant 0 : index
    %c0_55 = arith.constant 0 : index
    %118 = vector.load %arg12[%c0_53, %c0_54, %c0_55] : memref<1x1x32xf32, #tpu.memory_space<vmem>>, vector<1x1x32xf32>
    %119 = vector.shape_cast %118 : vector<1x1x32xf32> to vector<1x32xf32>
    %120 = vector.broadcast %119 : vector<1x32xf32> to vector<16x32xf32>
    %121 = arith.addf %117, %120 : vector<16x32xf32>
    %122 = arith.addf %103, %121 : vector<16x32xf32>
    %cst_56 = arith.constant dense<0.000000e+00> : vector<16xf32>
    %123 = vector.multi_reduction <add>, %122, %cst_56 [1] : vector<16x32xf32> to vector<16xf32>
    %124 = vector.shape_cast %123 : vector<16xf32> to vector<16x1xf32>
    %cst_57 = arith.constant 3.200000e+01 : f32
    %125 = vector.broadcast %cst_57 : f32 to vector<16x1xf32>
    %126 = arith.divf %124, %125 : vector<16x1xf32>
    %127 = vector.broadcast %126 : vector<16x1xf32> to vector<16x32xf32>
    %128 = arith.subf %122, %127 : vector<16x32xf32>
    %129 = arith.mulf %128, %128 : vector<16x32xf32>
    %cst_58 = arith.constant dense<0.000000e+00> : vector<16xf32>
    %130 = vector.multi_reduction <add>, %129, %cst_58 [1] : vector<16x32xf32> to vector<16xf32>
    %131 = vector.shape_cast %130 : vector<16xf32> to vector<16x1xf32>
    %cst_59 = arith.constant 3.200000e+01 : f32
    %132 = vector.broadcast %cst_59 : f32 to vector<16x1xf32>
    %133 = arith.divf %131, %132 : vector<16x1xf32>
    %cst_60 = arith.constant 9.99999974E-6 : f32
    %134 = vector.broadcast %cst_60 : f32 to vector<16x1xf32>
    %135 = arith.addf %133, %134 : vector<16x1xf32>
    %136 = math.rsqrt %135 : vector<16x1xf32>
    %137 = vector.broadcast %136 : vector<16x1xf32> to vector<16x32xf32>
    %138 = arith.mulf %128, %137 : vector<16x32xf32>
    %c0_61 = arith.constant 0 : index
    %c0_62 = arith.constant 0 : index
    %c0_63 = arith.constant 0 : index
    %139 = vector.load %arg15[%c0_61, %c0_62, %c0_63] : memref<1x1x32xf32, #tpu.memory_space<vmem>>, vector<1x1x32xf32>
    %140 = vector.shape_cast %139 : vector<1x1x32xf32> to vector<1x32xf32>
    %141 = vector.broadcast %140 : vector<1x32xf32> to vector<16x32xf32>
    %142 = arith.mulf %138, %141 : vector<16x32xf32>
    %c0_64 = arith.constant 0 : index
    %c0_65 = arith.constant 0 : index
    %c0_66 = arith.constant 0 : index
    %143 = vector.load %arg16[%c0_64, %c0_65, %c0_66] : memref<1x1x32xf32, #tpu.memory_space<vmem>>, vector<1x1x32xf32>
    %144 = vector.shape_cast %143 : vector<1x1x32xf32> to vector<1x32xf32>
    %145 = vector.broadcast %144 : vector<1x32xf32> to vector<16x32xf32>
    %146 = arith.addf %142, %145 : vector<16x32xf32>
    %c0_67 = arith.constant 0 : index
    %c0_68 = arith.constant 0 : index
    %147 = vector.load %arg17[%c0_67, %c0_68] : memref<16x32xf32, #tpu.memory_space<vmem>>, vector<16x32xf32>
    tpu.vector_store %arg17[%c0_67, %c0_68], %146 {strides = array<i32>} : memref<16x32xf32, #tpu.memory_space<vmem>>, vector<16x32xf32>,
    return
  }
  func.func @transform_0(%arg0: i32, %arg1: i32) -> (i32, i32) {
    %c0_i32 = arith.constant 0 : i32
    %c0_i32_0 = arith.constant 0 : i32
    return %arg0, %c0_i32 : i32, i32
  }
  func.func @transform_1(%arg0: i32, %arg1: i32) -> (i32, i32) {
    %c0_i32 = arith.constant 0 : i32
    %c0_i32_0 = arith.constant 0 : i32
    return %arg0, %c0_i32 : i32, i32
  }
  func.func @transform_2(%arg0: i32, %arg1: i32) -> (i32, i32) {
    %c0_i32 = arith.constant 0 : i32
    %c0_i32_0 = arith.constant 0 : i32
    %c0_i32_1 = arith.constant 0 : i32
    return %c0_i32, %c0_i32_0 : i32, i32
  }
  func.func @transform_3(%arg0: i32, %arg1: i32) -> (i32, i32, i32) {
    %c0_i32 = arith.constant 0 : i32
    %c0_i32_0 = arith.constant 0 : i32
    %c0_i32_1 = arith.constant 0 : i32
    return %arg1, %c0_i32, %c0_i32_0 : i32, i32, i32
  }
  func.func @transform_4(%arg0: i32, %arg1: i32) -> (i32, i32, i32) {
    %c0_i32 = arith.constant 0 : i32
    %c0_i32_0 = arith.constant 0 : i32
    %c0_i32_1 = arith.constant 0 : i32
    return %arg1, %c0_i32, %c0_i32_0 : i32, i32, i32
  }
  func.func @transform_5(%arg0: i32, %arg1: i32) -> (i32, i32, i32) {
    %c0_i32 = arith.constant 0 : i32
    %c0_i32_0 = arith.constant 0 : i32
    %c0_i32_1 = arith.constant 0 : i32
    return %arg1, %c0_i32, %c0_i32_0 : i32, i32, i32
  }
  func.func @transform_6(%arg0: i32, %arg1: i32) -> (i32, i32, i32) {
    %c0_i32 = arith.constant 0 : i32
    %c0_i32_0 = arith.constant 0 : i32
    %c0_i32_1 = arith.constant 0 : i32
    return %arg1, %c0_i32, %c0_i32_0 : i32, i32, i32
  }
  func.func @transform_7(%arg0: i32, %arg1: i32) -> (i32, i32, i32) {
    %c0_i32 = arith.constant 0 : i32
    %c0_i32_0 = arith.constant 0 : i32
    %c0_i32_1 = arith.constant 0 : i32
    return %arg1, %c0_i32, %c0_i32_0 : i32, i32, i32
  }
  func.func @transform_8(%arg0: i32, %arg1: i32) -> (i32, i32, i32) {
    %c0_i32 = arith.constant 0 : i32
    %c0_i32_0 = arith.constant 0 : i32
    %c0_i32_1 = arith.constant 0 : i32
    return %arg1, %c0_i32, %c0_i32_0 : i32, i32, i32
  }
  func.func @transform_9(%arg0: i32, %arg1: i32) -> (i32, i32, i32) {
    %c0_i32 = arith.constant 0 : i32
    %c0_i32_0 = arith.constant 0 : i32
    %c0_i32_1 = arith.constant 0 : i32
    return %arg1, %c0_i32, %c0_i32_0 : i32, i32, i32
  }
  func.func @transform_10(%arg0: i32, %arg1: i32) -> (i32, i32, i32) {
    %c0_i32 = arith.constant 0 : i32
    %c0_i32_0 = arith.constant 0 : i32
    %c0_i32_1 = arith.constant 0 : i32
    return %arg1, %c0_i32, %c0_i32_0 : i32, i32, i32
  }
  func.func @transform_11(%arg0: i32, %arg1: i32) -> (i32, i32, i32) {
    %c0_i32 = arith.constant 0 : i32
    %c0_i32_0 = arith.constant 0 : i32
    %c0_i32_1 = arith.constant 0 : i32
    return %arg1, %c0_i32, %c0_i32_0 : i32, i32, i32
  }
  func.func @transform_12(%arg0: i32, %arg1: i32) -> (i32, i32, i32) {
    %c0_i32 = arith.constant 0 : i32
    %c0_i32_0 = arith.constant 0 : i32
    %c0_i32_1 = arith.constant 0 : i32
    return %arg1, %c0_i32, %c0_i32_0 : i32, i32, i32
  }
  func.func @transform_13(%arg0: i32, %arg1: i32) -> (i32, i32, i32) {
    %c0_i32 = arith.constant 0 : i32
    %c0_i32_0 = arith.constant 0 : i32
    %c0_i32_1 = arith.constant 0 : i32
    return %arg1, %c0_i32, %c0_i32_0 : i32, i32, i32
  }
  func.func @transform_14(%arg0: i32, %arg1: i32) -> (i32, i32, i32) {
    %c0_i32 = arith.constant 0 : i32
    %c0_i32_0 = arith.constant 0 : i32
    %c0_i32_1 = arith.constant 0 : i32
    return %arg1, %c0_i32, %c0_i32_0 : i32, i32, i32
  }
  func.func @transform_15(%arg0: i32, %arg1: i32) -> (i32, i32) {
    %c0_i32 = arith.constant 0 : i32
    %c0_i32_0 = arith.constant 0 : i32
    return %arg0, %c0_i32 : i32, i32
  }
}

</mosaic_0001>

<bundles_post_ra>
// kernel: decoder_forward.1
= control target key start
LH: loop header
LB: loop body
LE: loop exit
PB: predicated region body
PF: predicated region fallthrough
CT: control target
= control target key end

     0   :  { %s4531_s0 = inlined_call_operand.vmem [shape: f32[16,32], index: 0, kind: input, shape index: {}]   ;;  %s4532_s1 = inlined_call_operand.vmem [shape: f32[2,8], index: 1, kind: input, shape index: {}]   ;;  %s4533_s2 = inlined_call_operand.vmem [shape: f32[8,8], index: 2, kind: input, shape index: {}]   ;;  %s4534_s3 = inlined_call_operand.vmem [shape: bf16[2,32,96], index: 3, kind: input, shape index: {}]   ;;  %s4535_s4 = inlined_call_operand.vmem [shape: f32[2,1,96], index: 4, kind: input, shape index: {}]   ;;  %s4536_s5 = inlined_call_operand.vmem [shape: bf16[2,32,32], index: 5, kind: input, shape index: {}]   ;;  %s4537_s6 = inlined_call_operand.vmem [shape: f32[2,1,32], index: 6, kind: input, shape index: {}]   ;;  %s4538_s7 = inlined_call_operand.vmem [shape: bf16[2,32,64], index: 7, kind: input, shape index: {}]   ;;  %s4539_s8 = inlined_call_operand.vmem [shape: f32[2,1,64], index: 8, kind: input, shape index: {}]   ;;  %s4540_s9 = inlined_call_operand.vmem [shape: bf16[2,64,32], index: 9, kind: input, shape index: {}]   ;;  %s4541_s10 = inlined_call_operand.vmem [shape: f32[2,1,32], index: 10, kind: input, shape index: {}]   ;;  %s4542_s11 = inlined_call_operand.vmem [shape: f32[2,1,32], index: 11, kind: input, shape index: {}]   ;;  %s4543_s12 = inlined_call_operand.vmem [shape: f32[2,1,32], index: 12, kind: input, shape index: {}]   ;;  %s4544_s13 = inlined_call_operand.vmem [shape: f32[2,1,32], index: 13, kind: input, shape index: {}]   ;;  %s4545_s14 = inlined_call_operand.hbm [shape: f32[2,1,32], index: 14, kind: input, shape index: {}]   ;;  %s4546_s15 = inlined_call_operand.hbm [shape: f32[16,32], index: 15, kind: output, shape index: {}]  }
   0x1   :  { %4555 = sst [smem:[#allocation14_spill]] %s4532_s1 }
   0x2   :  { %4556 = sst [smem:[#allocation15_spill]] %s4533_s2 }
   0x3   :  { %4557 = sst [smem:[#allocation16_spill]] %s4534_s3 }
   0x4   :  { %4558 = sst [smem:[#allocation17_spill]] %s4536_s5 }
   0x5   :  { %4559 = sst [smem:[#allocation18_spill]] %s4538_s7 }
   0x6   :  { %4560 = sst [smem:[#allocation19_spill]] %s4545_s14 }
   0x7   :  { %4561 = sst [smem:[#allocation20_spill]] %s4546_s15 }
   0x8   :  { %20 = vsyncpa [#allocation3], 0 }
   0x9   :  { %22 = vsyncpa [#allocation3 + $0x1], 0 }
   0xa   :  { %23 = vsyncpa [#allocation4], 0  ;;  %s3811_s18 = smov 0   ;;  %s3813_s19 = smov 0  }
   0xb   :  { %s3815_s20 = smov 0   ;;  %s3817_s21 = smov 0  }
   0xc   :  { %s3819_s22 = smov 0   ;;  %s3821_s23 = smov 0  }
   0xd LB: > { %4562 = sst [smem:[#allocation8_spill]] %s3691_s19  ;;  %s4549_s24 = sadd.s32 4294967295, %s3707_s23   ;;  %s3707_s23 = sphi %s3821_s23, %s29_s23   ;;  %s3703_s22 = sphi %s3819_s22, %s4592_s22   ;;  %s3699_s21 = sphi %s3817_s21, %s4591_s21   ;;  %s3695_s20 = sphi %s3815_s20, %s4590_s20   ;;  %s3691_s19 = sphi %s3813_s19, %s4589_s19   ;;  %s3687_s18 = sphi %s3811_s18, %s4588_s18  }
   0xe   : > { %4563 = sst [smem:[#allocation9_spill]] %s3695_s20  ;;  %s38_s25 = sadd.s32 1, %s3703_s22 }
   0xf   : > { %4564 = sst [smem:[#allocation10_spill]] %s3703_s22  ;;  %p39_p0 = scmp.ge.s32.totalorder %s38_s25, 2 }
  0x10   : > { %4565 = sst [smem:[#allocation11_spill]] %s3707_s23  ;;  %s407_s26 = sadd.s32 1, %s3695_s20 }
  0x11   : > { %p414_p1 = scmp.ne.s32.totalorder %s3695_s20, %s3691_s19  ;;  %p415_p2 = scmp.eq.s32.totalorder %s3707_s23, 0 }
  0x12   : > { %s4594_s25 = smov (%p39_p0, %s38_s25), 0  ;;  %p420_p4 = scmp.ne.s32.totalorder %s3691_s19, %s3687_s18 }
  0x13   : > { %4566 = sst [smem:[#allocation12_spill]] %s4594_s25  ;;  %p3847_p3 = por %p415_p2, %p414_p1 }
  0x14   : > { %s404_s28 = ssub.s32 %s3703_s22, %s4594_s25  ;;  %p421_p5 = scmp.eq.s32.totalorder %s4549_s24, 0 }
  0x15   : > { %p405_p6 = scmp.eq.s32.totalorder %s404_s28, 0  ;;  %p3458_p8 = scmp.lt.s32.totalorder %s3707_s23, 2 }
  0x16   : > { %p3856_p7 = por %p421_p5, %p420_p4  ;;  %s563_s16 = sand.u32 1, %s3695_s20  }
  0x17   : > { %s3862_s30 = scalar_select %p405_p6, %s3695_s20, %s407_s26  }
  0x18   : > { %s3207_s17 = sshll.u32 %s3703_s22, 4  ;;  %s4570_s14 = sld [smem:[#allocation19_spill]] }
  0x19   : > { %4569 = sst [smem:[#allocation13_spill]] %s3862_s30  ;;  %s566_s18 = scalar_lea.vmem [#allocation2], %s563_s16 }
  0x1a   : > { %s573_s28 = sshll.u32 %s566_s18, 4  ;;  %p3875_p9 = pnand %p3458_p8, %p3847_p3  ;;  %s3871_s28 = int_to_ptr.vmem [resolvable:$true] %s573_s28 }
  0x1b   : > { %s564_s1 = scalar_lea.sflag [#allocation3], %s563_s16 }
  0x1c   : > { %p3599_p13 = pneg %p3875_p9 }
  0x1e   : > { %s3869_s2 = scalar_lea.hbm %s4570_s14, %s3207_s17  ;;  %s3602_s27 = scalar_lea.hbm %s4570_s14, 32 }
  0x1f   : > { %s3597_s15 = scalar_lea.hbm %s3869_s2, 16  ;;  %p3603_p2 = scmp.lt.u32.totalorder %s3869_s2, %s4570_s14 }
  0x20   : > { %p3598_p12 = scmp.ne.s32.totalorder %s3869_s2, %s3597_s15  ;;  %p3604_p3 = scmp.lt.u32.totalorder %s3602_s27, %s3597_s15 }
  0x21   : > { %p3606_p5 = scmp.lt.u32.totalorder %s3597_s15, %s3869_s2 }
  0x22   : > { %p3600_p0 = pnand %p3599_p13, %p3598_p12  ;;  %p3605_p4 = por %p3604_p3, %p3603_p2 }
  0x24   : > { %p3601_p1 = pneg %p3600_p0  ;;  %p3607_p6 = por %p3606_p5, %p3605_p4 }
  0x26   : > { %p3608_p8 = pnand %p3607_p6, %p3601_p1 }
  0x28   : > { %3611 = shalt.err (!%p3608_p8)
}
  0x29   : > { %s3612_s16 = scalar_lea.vmem %s3871_s28, 16  ;;  %s3709_s26 = smov [#allocation2]  }
  0x2a   : > { %p3613_p12 = scmp.ne.s32.totalorder %s3871_s28, %s3612_s16  ;;  %s3617_s17 = sshll.u32 %s3709_s26, 4  ;;  %s3618_s17 = int_to_ptr.vmem [resolvable:$false] %s3617_s17 }
  0x2b   : > { %s3619_s25 = scalar_lea.vmem %s3618_s17, 32  ;;  %p3620_p11 = scmp.lt.s32.totalorder %s3871_s28, %s3618_s17 }
  0x2c   : > { %p3615_p0 = pnand %p3613_p12, %p3599_p13  ;;  %p3621_p2 = scmp.lt.s32.totalorder %s3619_s25, %s3612_s16 }
  0x2e   : > { %p3616_p10 = pneg %p3615_p0  ;;  %p3622_p3 = por %p3621_p2, %p3620_p11 }
  0x30   : > { %p3623_p4 = pnand %p3622_p3, %p3616_p10 }
  0x32   : > { %3626 = shalt.err (!%p3623_p4)
}
  0x33   : > { %3457 = dma.hbm_to_vmem [thread:$0]  (!%p3875_p9), %s3869_s2, 16, %s3871_s28, %s564_s1  }
  0x34   : > { %p4572_p1 = scmp.lt.s32.totalorder %s3707_s23, 3  ;;  %p4573_p5 = scmp.ge.s32.totalorder %s3707_s23, 1 }
  0x36   : > { %p579_p13 = pnand %p4573_p5, %p4572_p1 }
  0x37   : > { %s584_s15 = sand.u32 (!%p579_p13), 1, %s3691_s19  }
  0x38   : > { %582 = sbr.rel (%p579_p13) target bundleno = 2926 (0xb6e), region = 80  ;;  %s585_s27 = scalar_lea.sflag (!%p579_p13), [#allocation3], %s584_s15 }
  0x39   : > { %s3911_s18 = scalar_lea.vmem (!%p579_p13), [#allocation2], %s584_s15 }
  0x3f   : > { %3678 = dma.done.wait (%p3856_p7), %s585_s27, 16  }
  0x40   : > { %3680 = vsyncadd (%p3856_p7), %s585_s27, 4294967280  ;;  %p688_p10 = scmp.lt.s32.totalorder %s3699_s21, 1  ;;  %s4574_s3 = sld [smem:[#allocation16_spill]] }
  0x41   : > { %s4575_s5 = sld [smem:[#allocation17_spill]]  ;;  %s4576_s7 = sld [smem:[#allocation18_spill]] }
  0x42   : > { %s3919_s24 = scalar_select %p688_p10, %s3699_s21, 1 }
  0x43   : > { %p3217_p7 = scmp.ne.s32.totalorder %s3699_s21, 0 }
  0x44   : > { %s3266_s2 = sshll.u32 %s3919_s24, 4  ;;  %s3269_s16 = sshll.u32 %s3919_s24, 5  ;;  %v735_v0 = vld [vmem:[%s4531_s0] sm:$0xff] (!%p3217_p7)  ;;  %vm737_vm0 = vcmask (!%p3217_p7), 261120   ;;  %v736_v1 = vld [vmem:[%s4531_s0 + $0x8] sm:$0xff] (!%p3217_p7) }
  0x45   : > { %s3951_s25 = scalar_lea.vmem %s4540_s9, %s3269_s16  ;;  %s719_s14 = scalar_lea.vmem %s4541_s10, %s3919_s24  ;;  %738 = vst.msk [vmem:[#allocation5] sm:$0xff] (!%p3217_p7), %vm737_vm0, %v735_v0  ;;  %739 = vst.msk [vmem:[#allocation5 + $0x8] sm:$0xff] (!%p3217_p7), %vm737_vm0, %v736_v1 }
  0x46   : > { %s692_s17 = scalar_lea.vmem %s4574_s3, %s3266_s2  ;;  %s722_s19 = scalar_lea.vmem %s4542_s11, %s3919_s24 }
  0x47   : > { %s3932_s27 = scalar_lea.vmem %s4575_s5, %s3266_s2  ;;  %s3941_s23 = scalar_lea.vmem %s4576_s7, %s3266_s2 }
  0x48   : > { %s725_s7 = scalar_lea.vmem %s4543_s12, %s3919_s24  ;;  %s728_s29 = scalar_lea.vmem %s4544_s13, %s3919_s24 }
  0x49   : > { %734 = sbr.rel (%p3217_p7) target bundleno = 80 (0x50), region = 88 }
  0x50 PF: > { %v3545_v2 = vld [vmem:[%s692_s17] sm:$0xff]   ;;  %v3710_v3 = vmov 0.0   ;;  %v3546_v4 = vld [vmem:[%s692_s17 + $0x8] sm:$0xff]   ;;  %vm3711_vm1 = vmmov 0   ;;  %vm766_vm2 = vcmask 261120   ;;  %s4577_s17 = scalar_lea.vmem %s4535_s4, %s3919_s24  ;;  %s3712_s15 = smov 104   ;;  %v847_v18 = vlaneseq }
  0x51   : > { %3316 = vmatprep.subr.bf16.mxu0 %v3710_v3  ;;  %3324 = vmatprep.subr.bf16.mxu1 %v3710_v3  ;;  %v740_v5 = vld [vmem:[#allocation5] sm:$0xff]  ;;  %v741_v6 = vld [vmem:[#allocation5 + $0x8] sm:$0xff]  ;;  %v3218_v8 = vld [vmem:[%s4577_s17] ss:$0 sm:$0xff]  ;;  %s3713_s22 = smov 120   ;;  %s3714_s20 = smov 96  }
  0x52   : > { %3317 = vmatpush3.bf16.msra.mxu0 %v3545_v2  ;;  %3320 = vmatprep.mubr.msk.bf16.mxu0 %vm3711_vm1, %v3710_v3  ;;  %v742_v7 = vpack.c.bf16 %v741_v6, %v740_v5  ;;  %s3715_s2 = smov 112   ;;  %s3716_s28 = smov 80   ;;  %v3723_v16 = vmov 1983009808   ;;  %v848_v22 = vshrl.u32 %v847_v18, 7  ;;  %vm1165_vm3 = vcmask 64512  }
  0x53   : > { %3318 = vmatprep.subr.bf16.mxu0 %v3710_v3  ;;  %3326 = vmatprep.mubr.msk.bf16.mxu1 %vm3711_vm1, %v3710_v3  ;;  %s3717_s1 = smov 88   ;;  %s3718_s3 = smov 64   ;;  %v845_v17 = vunpack.c.l.s4 %v3723_v16  ;;  %v3724_v25 = vmov 1934713408   ;;  %vm1407_vm4 = vcmask 1043456   ;;  %vm1746_vm5 = vcmask 130048  }
  0x54   : > { %s3719_s16 = smov 72   ;;  %s3720_s5 = smov 48   ;;  %v878_v26 = vunpack.c.l.s4 %v3724_v25  ;;  %vm1748_vm6 = vcmask 195584   ;;  %vm2898_vm7 = vcmask 523264  }
  0x55   : > { %s3721_s26 = smov 56   ;;  %s3722_s21 = smov 40   ;;  %v846_v21 = vunpack.c.0.s8 %v845_v17 }
  0x56   : > { %3319 = vmatpush3.bf16.msra.mxu0 %v3546_v4  ;;  %v879_v31 = vunpack.c.0.s8 %v878_v26 }
  0x57   : > { %3330 = vmatprep.subr.bf16.mxu0 %v3710_v3  ;;  %v3992_v28 = vsub.s32 %v846_v21, %v848_v22 }
  0x58   : > { %v3996_v43 = vsub.s32 %v879_v31, %v848_v22 }
  0x59   : > { %3321 = vmatmul.mubr.msk.bf16.vlgmr.msra.gmra.mrb[0].mxu0 %vm766_vm2, %v742_v7 }
  0x5a   : > { %3332 = vmatprep.mubr.msk.bf16.mxu0 %vm3711_vm1, %v3710_v3 }
 0x12c   : > { %v804_v9 = vpop.f32.mrb[0].mxu0 }
 0x12d   : > { %v3322_v10 = vpop.f32.mrb[1].mxu0  ;;  %v805_v12 = vadd.f32 %v3218_v8, %v804_v9 }
 0x12e   : > { %v807_v11 = vpop.f32.mrb[2].mxu0 }
 0x12f   : > { %v808_v13 = vadd.f32 %v3218_v8, %v807_v11  ;;  %v3323_v14 = vpop.f32.mrb[3].mxu0 }
 0x131   : > { %v811_v15 = vpack.c.bf16 %v808_v13, %v805_v12 }
 0x133   : > { %820 = vrot.lane.b32.xlu1 %v811_v15, %s3712_s15  ;;  %814 = vrot.lane.b32.xlu0 %v811_v15, %s3713_s22  ;;  %v1750_v30 = vrot.slane %v811_v15, 4  ;;  %s4578_s15 = sld [smem:[#allocation15_spill]] }
 0x137   : > { %823 = vrot.lane.b32.xlu1 %v811_v15, %s3714_s20  ;;  %817 = vrot.lane.b32.xlu0 %v811_v15, %s3715_s2  ;;  %s4579_s2 = sld [smem:[#allocation14_spill]]  ;;  %s4581_s20 = scalar_lea.vmem %s4539_s8, %s3919_s24 }
 0x13b   : > { %829 = vrot.lane.b32.xlu1 %v811_v15, %s3716_s28  ;;  %826 = vrot.lane.b32.xlu0 %v811_v15, %s3717_s1 }
 0x13f   : > { %835 = vrot.lane.b32.xlu1 %v811_v15, %s3718_s3  ;;  %832 = vrot.lane.b32.xlu0 %v811_v15, %s3719_s16  ;;  %s3727_s3 = smov 8   ;;  %s3728_s16 = smov 24  }
 0x143   : > { %839 = vrot.lane.b32.xlu1 %v811_v15, %s3720_s5  ;;  %837 = vrot.lane.b32.xlu0 %v811_v15, %s3721_s26 }
 0x147   : > { %841 = vrot.lane.b32.xlu0 %v811_v15, %s3722_s21  ;;  %s4580_s21 = scalar_lea.vmem %s4537_s6, %s3919_s24 }
 0x1a5   : > { %v821_v19 = vpop.permute.xlu1 %820  ;;  %v815_v20 = vpop.permute.xlu0 %814 }
 0x1a6   : > { %v1751_v38 = vrot.slane %v815_v20, 4  ;;  %v1753_v48 = vrot.slane %v821_v19, 4 }
 0x1a9   : > { %v824_v23 = vpop.permute.xlu1 %823  ;;  %v818_v24 = vpop.permute.xlu0 %817 }
 0x1aa   : > { %v1754_v27 = vrot.slane %v824_v23, 4  ;;  %v843_v29 = vcombine.low %v811_v15, %v824_v23  ;;  %v1752_v35 = vrot.slane %v818_v24, 4 }
 0x1ac   : > { %v1770_v34 = vcombine.low %v1750_v30, %v1754_v27  ;;  %v850_v40 = vrot.slane %v843_v29, %v3992_v28 }
 0x1ad   : > { %v830_v32 = vpop.permute.xlu1 %829  ;;  %v827_v33 = vpop.permute.xlu0 %826 }
 0x1ae   : > { %v851_v36 = vcombine.low %v818_v24, %v830_v32  ;;  %v1756_v37 = vrot.slane %v830_v32, 4  ;;  %v1755_v39 = vrot.slane %v827_v33, 4  ;;  %v911_v44 = vcombine.low %v815_v20, %v827_v33 }
 0x1af   : > { %v1777_v49 = vrot.slane %v1770_v34, %v3992_v28 }
 0x1b0   : > { %v858_v41 = vrot.slane %v851_v36, %v3992_v28  ;;  %v1778_v42 = vcombine.low %v1752_v35, %v1756_v37  ;;  %v1838_v45 = vcombine.low %v1751_v38, %v1755_v39  ;;  %v918_v58 = vrot.slane %v911_v44, %v3992_v28 }
 0x1b1   : > { %v836_v46 = vpop.permute.xlu1 %835  ;;  %v833_v47 = vpop.permute.xlu0 %832 }
 0x1b2   : > { %v875_v50 = vcombine.low %v850_v40, %v858_v41  ;;  %v1785_v51 = vrot.slane %v1778_v42, %v3992_v28  ;;  %v876_v52 = vcombine.high %v850_v40, %v858_v41  ;;  %v1758_v53 = vrot.slane %v836_v46, 4 }
 0x1b3   : > { %v919_v54 = vcombine.low %v821_v19, %v833_v47  ;;  %v1757_v55 = vrot.slane %v833_v47, 4  ;;  %v866_v59 = vrot.slane %v836_v46, %v3992_v28  ;;  %v1845_v1 = vrot.slane %v1838_v45, %v3992_v28 }
 0x1b4   : > { %v1802_v56 = vcombine.low %v1777_v49, %v1785_v51  ;;  %v1803_v57 = vcombine.high %v1777_v49, %v1785_v51  ;;  %v883_v0 = vrot.slane %v875_v50, %v3996_v43  ;;  %v890_v5 = vrot.slane %v876_v52, %v3996_v43 }
 0x1b5   : > { %v926_v60 = vrot.slane %v919_v54, %v3992_v28  ;;  %v1846_v61 = vcombine.low %v1753_v48, %v1757_v55  ;;  %v840_v62 = vpop.permute.xlu1 %839  ;;  %v838_v63 = vpop.permute.xlu0 %837  ;;  %v1793_v6 = vrot.slane %v1758_v53, %v3992_v28 }
 0x1b6   : > { %v874_v2 = vrot.slane %v840_v62, %v3992_v28  ;;  %v1760_v4 = vrot.slane %v840_v62, 4  ;;  %v1810_v9 = vrot.slane %v1802_v56, %v3996_v43  ;;  %v1759_v16 = vrot.slane %v838_v63, 4 }
 0x1b7   : > { %v943_v7 = vcombine.low %v918_v58, %v926_v60  ;;  %v1853_v8 = vrot.slane %v1846_v61, %v3992_v28  ;;  %v944_v13 = vcombine.high %v918_v58, %v926_v60  ;;  %v1817_v22 = vrot.slane %v1803_v57, %v3996_v43 }
 0x1b8   : > { %v891_v10 = vcombine.low %v866_v59, %v874_v2  ;;  %v892_v11 = vcombine.high %v866_v59, %v874_v2  ;;  %v1801_v12 = vrot.slane %v1760_v4, %v3992_v28  ;;  %v934_v24 = vrot.slane %v838_v63, %v3992_v28 }
 0x1b9   : > { %v1870_v14 = vcombine.low %v1845_v1, %v1853_v8  ;;  %v1871_v15 = vcombine.high %v1845_v1, %v1853_v8  ;;  %v842_v17 = vpop.permute.xlu0 %841  ;;  %v951_v23 = vrot.slane %v943_v7, %v3996_v43  ;;  %v958_v35 = vrot.slane %v944_v13, %v3996_v43 }
 0x1ba   : > { %v899_v18 = vrot.slane %v891_v10, %v3996_v43  ;;  %v906_v19 = vrot.slane %v892_v11, %v3996_v43  ;;  %v1818_v20 = vcombine.low %v1793_v6, %v1801_v12  ;;  %v1819_v21 = vcombine.high %v1793_v6, %v1801_v12 }
 0x1bb   : > { %v942_v25 = vrot.slane %v842_v17, %v3992_v28  ;;  %v1878_v36 = vrot.slane %v1870_v14, %v3996_v43  ;;  %v1885_v37 = vrot.slane %v1871_v15, %v3996_v43  ;;  %v1861_v38 = vrot.slane %v1759_v16, %v3992_v28 }
 0x1bc   : > { %v907_v26 = vcombine.low %v883_v0, %v899_v18  ;;  %v908_v27 = vcombine.high %v883_v0, %v899_v18  ;;  %v909_v29 = vcombine.low %v890_v5, %v906_v19  ;;  %v910_v30 = vcombine.high %v890_v5, %v906_v19 }
 0x1bd   : > { %v1826_v31 = vrot.slane %v1818_v20, %v3996_v43  ;;  %v1833_v32 = vrot.slane %v1819_v21, %v3996_v43  ;;  %v959_v33 = vcombine.low %v934_v24, %v942_v25  ;;  %v960_v34 = vcombine.high %v934_v24, %v942_v25 }
 0x1be   : > { %v983_v44 = vshrl.u32 %v907_v26, 16  ;;  %v1761_v47 = vrot.slane %v842_v17, 4  ;;  %v991_v48 = vshrl.u32 %v908_v27, 16  ;;  %v999_v49 = vshrl.u32 %v909_v29, 16 }
 0x1bf   : > { %v1834_v39 = vcombine.low %v1810_v9, %v1826_v31  ;;  %v1835_v40 = vcombine.high %v1810_v9, %v1826_v31  ;;  %v4023_v41 = vcombine.low %v1817_v22, %v1833_v32  ;;  %v4025_v42 = vcombine.high %v1817_v22, %v1833_v32 }
 0x1c0   : > { %v967_v45 = vrot.slane %v959_v33, %v3996_v43  ;;  %v974_v46 = vrot.slane %v960_v34, %v3996_v43  ;;  %v1007_v50 = vshrl.u32 %v910_v30, 16  ;;  %v1869_v59 = vrot.slane %v1761_v47, %v3992_v28 }
 0x1c1   : > { %v1910_v51 = vshrl.u32 %v1834_v39, 16  ;;  %v1918_v56 = vshrl.u32 %v1835_v40, 16  ;;  %v1926_v57 = vshrl.u32 %v4023_v41, 16  ;;  %v1934_v58 = vshrl.u32 %v4025_v42, 16 }
 0x1c2   : > { %v975_v52 = vcombine.low %v951_v23, %v967_v45  ;;  %v976_v53 = vcombine.high %v951_v23, %v967_v45  ;;  %v977_v54 = vcombine.low %v958_v35, %v974_v46  ;;  %v978_v55 = vcombine.high %v958_v35, %v974_v46 }
 0x1c3   : > { %v1886_v7 = vcombine.low %v1861_v38, %v1869_v59  ;;  %v1887_v8 = vcombine.high %v1861_v38, %v1869_v59 }
 0x1c4   : > { %v981_v60 = vpack.i.b16 %v975_v52, %v907_v26  ;;  %v984_v61 = vshrl.u32 %v975_v52, 16  ;;  %v989_v62 = vpack.i.b16 %v976_v53, %v908_v27  ;;  %v992_v63 = vshrl.u32 %v976_v53, 16 }
 0x1c5   : > { %v997_v0 = vpack.i.b16 %v977_v54, %v909_v29  ;;  %v1000_v1 = vshrl.u32 %v977_v54, 16  ;;  %v1005_v2 = vpack.i.b16 %v978_v55, %v910_v30  ;;  %v1008_v4 = vshrl.u32 %v978_v55, 16 }
 0x1c6   : > { %v985_v5 = vpack.i.b16 %v984_v61, %v983_v44  ;;  %v993_v6 = vpack.i.b16 %v992_v63, %v991_v48  ;;  %v1894_v15 = vrot.slane %v1886_v7, %v3996_v43  ;;  %v1901_v16 = vrot.slane %v1887_v8, %v3996_v43 }
 0x1c7   : > { %v1001_v9 = vpack.i.b16 %v1000_v1, %v999_v49  ;;  %v1009_v10 = vpack.i.b16 %v1008_v4, %v1007_v50  ;;  %v1011_v11 = vcombine.low %v981_v60, %v997_v0  ;;  %v1012_v12 = vcombine.high %v981_v60, %v997_v0 }
 0x1c8   : > { %v1027_v13 = vcombine.low %v989_v62, %v1005_v2  ;;  %v1028_v14 = vcombine.high %v989_v62, %v1005_v2  ;;  %v1902_v22 = vcombine.low %v1878_v36, %v1894_v15  ;;  %v1903_v23 = vcombine.high %v1878_v36, %v1894_v15 }
 0x1c9   : > { %v1026_v17 = vrot.slane %v1012_v12, %v3992_v28  ;;  %v1071_v18 = vcombine.high %v985_v5, %v1001_v9  ;;  %v1087_v19 = vcombine.high %v993_v6, %v1009_v10  ;;  %v1019_v20 = vrot.slane %v1011_v11, %v3992_v28 }
 0x1ca   : > { %v1042_v21 = vrot.slane %v1028_v14, %v3992_v28  ;;  %v1904_v24 = vcombine.low %v1885_v37, %v1901_v16  ;;  %v1905_v25 = vcombine.high %v1885_v37, %v1901_v16  ;;  %v1035_v26 = vrot.slane %v1027_v13, %v3992_v28 }
 0x1cb   : > { %v1070_v27 = vcombine.low %v985_v5, %v1001_v9  ;;  %v1086_v29 = vcombine.low %v993_v6, %v1009_v10  ;;  %v4038_v30 = vpack.i.b16 %v1902_v22, %v1834_v39  ;;  %v1911_v31 = vshrl.u32 %v1902_v22, 16 }
 0x1cc   : > { %v4040_v32 = vpack.i.b16 %v1903_v23, %v1835_v40  ;;  %v1919_v33 = vshrl.u32 %v1903_v23, 16  ;;  %v4043_v34 = vpack.i.b16 %v1904_v24, %v4023_v41  ;;  %v1927_v35 = vshrl.u32 %v1904_v24, 16 }
 0x1cd   : > { %v4046_v38 = vpack.i.b16 %v1905_v25, %v4025_v42  ;;  %v1935_v36 = vshrl.u32 %v1905_v25, 16  ;;  %v4048_v44 = vpack.i.b16 %v1911_v31, %v1910_v51  ;;  %v1043_v45 = vcombine.low %v1019_v20, %v1035_v26 }
 0x1ce   : > { %v4050_v37 = vpack.i.b16 %v1919_v33, %v1918_v56  ;;  %v1044_v46 = vcombine.high %v1019_v20, %v1035_v26  ;;  %v4052_v39 = vpack.i.b16 %v1927_v35, %v1926_v57  ;;  %v1938_v40 = vcombine.low %v4038_v30, %v4043_v34 }
 0x1cf   : > { %v4054_v47 = vpack.i.b16 %v1935_v36, %v1934_v58  ;;  %v1939_v41 = vcombine.high %v4038_v30, %v4043_v34  ;;  %v1954_v42 = vcombine.low %v4040_v32, %v4046_v38  ;;  %v1955_v48 = vcombine.high %v4040_v32, %v4046_v38 }
 0x1d0   : > { %v1078_v49 = vrot.slane %v1070_v27, %v3992_v28  ;;  %v1997_v50 = vcombine.low %v4048_v44, %v4052_v39  ;;  %v1998_v51 = vcombine.high %v4048_v44, %v4052_v39  ;;  %v1058_v54 = vrot.slane %v1044_v46, %v3996_v43 }
 0x1d1   : > { %v2013_v52 = vcombine.low %v4050_v37, %v4054_v47  ;;  %v2014_v53 = vcombine.high %v4050_v37, %v4054_v47  ;;  %v1094_v55 = vrot.slane %v1086_v29, %v3992_v28  ;;  %v4076_v56 = vrot.slane %v1043_v45, %v3996_v43 }
 0x1d2   : > { %v1059_v57 = vcombine.low %v1026_v17, %v1042_v21  ;;  %v1085_v58 = vrot.slane %v1071_v18, %v3992_v28  ;;  %v1101_v59 = vrot.slane %v1087_v19, %v3992_v28  ;;  %v1144_v1 = vshrl.u32 %v1058_v54, 16 }
 0x1d3   : > { %v1102_v60 = vcombine.low %v1078_v49, %v1094_v55  ;;  %v1103_v61 = vcombine.high %v1078_v49, %v1094_v55  ;;  %v3725_v4 = vmov 0   ;;  %v1132_v6 = vshrl.u32 %v4076_v56, 16 }
 0x1d4   : > { %v4081_v62 = vrot.slane %v1059_v57, %v3996_v43  ;;  %v1118_v63 = vcombine.low %v1085_v58, %v1101_v59  ;;  %v1068_v5 = vcombine.high %v1058_v54, %v3725_v4  ;;  %v1946_v8 = vrot.slane %v1938_v40, %v3992_v28 }
 0x1d5   : > { %v1117_v0 = vrot.slane %v1103_v61, %v3996_v43  ;;  %v1110_v2 = vrot.slane %v1102_v60, %v3996_v43  ;;  %v1962_v9 = vrot.slane %v1954_v42, %v3992_v28  ;;  %v2005_v16 = vrot.slane %v1997_v50, %v3992_v28 }
 0x1d6   : > { %v1069_v7 = vcombine.high %v4081_v62, %v3725_v4  ;;  %v4093_v13 = vrot.slane %v1118_v63, %v3996_v43  ;;  %v2021_v17 = vrot.slane %v2013_v52, %v3992_v28  ;;  %v1150_v23 = vshrl.u32 %v1068_v5, 16 }
 0x1d7   : > { %v1143_v10 = vpack.i.b16 %v1117_v0, %v1058_v54  ;;  %v1145_v11 = vshrl.u32 %v1117_v0, 16  ;;  %v1127_v12 = vcombine.high %v1117_v0, %v3725_v4  ;;  %v1133_v14 = vshrl.u32 %v1110_v2, 16 }
 0x1d8   : > { %v4096_v15 = vcombine.high %v1110_v2, %v3725_v4  ;;  %v1131_v22 = vpack.i.b16 %v1110_v2, %v4076_v56  ;;  %v4104_v24 = vcombine.high %v4076_v56, %v3725_v4  ;;  %v1156_v25 = vshrl.u32 %v4081_v62, 16 }
 0x1d9   : > { %v1170_v18 = vsel %vm1165_vm3, %v1143_v10, 0  ;;  %v1146_v19 = vpack.i.b16 %v1145_v11, %v1144_v1  ;;  %v1149_v20 = vpack.i.b16 %v1127_v12, %v1068_v5  ;;  %v1151_v21 = vshrl.u32 %v1127_v12, 16 }
 0x1da   : > { %3325 = vmatpush3.bf16.xpose.msra.mxu1 %v1170_v18  ;;  %v1134_v27 = vpack.i.b16 %v1133_v14, %v1132_v6  ;;  %v1155_v29 = vpack.i.b16 %v4093_v13, %v4081_v62  ;;  %v1157_v31 = vshrl.u32 %v4093_v13, 16  ;;  %v1139_v35 = vshrl.u32 %v4096_v15, 16 }
 0x1db   : > { %v1216_v26 = vsel %vm1165_vm3, %v1146_v19, 0  ;;  %3336 = vmatprep.subr.bf16.mxu1 %v3710_v3  ;;  %v1262_v33 = vsel %vm1165_vm3, %v1149_v20, 0  ;;  %v1128_v36 = vcombine.high %v4093_v13, %v3725_v4  ;;  %v1970_v45 = vcombine.low %v1946_v8, %v1962_v9 }
 0x1dc   : > { %3331 = vmatpush3.bf16.xpose.msra.mxu0 %v1216_v26  ;;  %v1152_v46 = vpack.i.b16 %v1151_v21, %v1150_v23  ;;  %v1162_v40 = vshrl.u32 %v1069_v7, 16  ;;  %v1971_v42 = vcombine.high %v1946_v8, %v1962_v9  ;;  %v2029_v49 = vcombine.low %v2005_v16, %v2021_v17 }
 0x1dd   : > { %3342 = vmatprep.subr.bf16.mxu0 %v3710_v3  ;;  %v1161_v50 = vpack.i.b16 %v1128_v36, %v1069_v7  ;;  %v1163_v52 = vshrl.u32 %v1128_v36, 16  ;;  %v2030_v54 = vcombine.high %v2005_v16, %v2021_v17  ;;  %v4118_v55 = vrot.slane %v1970_v45, %v3996_v43 }
 0x1de   : > { %v4121_v56 = vrot.slane %v1971_v42, %v3996_v43  ;;  %v4124_v57 = vrot.slane %v2029_v49, %v3996_v43  ;;  %v1953_v58 = vrot.slane %v1939_v41, %v3992_v28  ;;  %v1969_v59 = vrot.slane %v1955_v48, %v3992_v28  ;;  %v4232_v42 = vld [vmem:[%s4578_s15] sm:$0xff] }
 0x1df   : > { %v4135_v60 = vsel %vm1407_vm4, %v1161_v50, 0  ;;  %v1164_v61 = vpack.i.b16 %v1163_v52, %v1162_v40  ;;  %v4138_v62 = vrot.slane %v2030_v54, %v3996_v43  ;;  %v2059_v63 = vshrl.u32 %v4118_v55, 16  ;;  %v3226_v49 = vld [vmem:[%s4579_s2] ss:$0 sm:$0xff] }
 0x1e0   : > { %v2071_v0 = vshrl.u32 %v4121_v56, 16  ;;  %v2058_v30 = vpack.i.b16 %v4124_v57, %v4118_v55  ;;  %v4147_v32 = vcombine.high %v4121_v56, %v3725_v4  ;;  %v2060_v34 = vshrl.u32 %v4124_v57, 16 }
 0x1e1   : > { %3327 = vmatmul.mubr.msk.bf16.vlgmr.msra.gmra.mrb[0].mxu1 %vm1165_vm3, %v1131_v22  ;;  %v4153_v38 = vsel %vm1407_vm4, %v1164_v61, 0  ;;  %v2070_v41 = vpack.i.b16 %v4138_v62, %v4121_v56  ;;  %v2072_v48 = vshrl.u32 %v4138_v62, 16  ;;  %v4160_v1 = vcombine.high %v4138_v62, %v3725_v4 }
 0x1e2   : > { %3337 = vmatpush3.bf16.xpose.msra.mxu1 %v1262_v33  ;;  %3338 = vmatprep.mubr.msk.bf16.mxu1 %vm3711_vm1, %v3710_v3  ;;  %v1308_v2 = vsel %vm1165_vm3, %v1152_v46, 0  ;;  %v4165_v5 = vpack.i.b16 %v2060_v34, %v2059_v63  ;;  %v4169_v6 = vcombine.high %v4118_v55, %v3725_v4  ;;  %v4173_v7 = vcombine.high %v4124_v57, %v3725_v4 }
 0x1e3   : > { %3333 = vmatmul.mubr.msk.bf16.vlgmr.msra.gmra.mrb[4].mxu0 %vm1165_vm3, %v1134_v27  ;;  %3348 = vmatprep.subr.bf16.mxu1 %v3710_v3  ;;  %v4177_v8 = vpack.i.b16 %v2072_v48, %v2071_v0  ;;  %v2076_v9 = vpack.i.b16 %v4160_v1, %v4147_v32  ;;  %v2077_v10 = vshrl.u32 %v4147_v32, 16  ;;  %v2078_v11 = vshrl.u32 %v4160_v1, 16 }
 0x1e4   : > { %3343 = vmatpush3.bf16.xpose.msra.mxu0 %v1308_v2  ;;  %3344 = vmatprep.mubr.msk.bf16.mxu0 %vm3711_vm1, %v3710_v3  ;;  %v2064_v12 = vpack.i.b16 %v4173_v7, %v4169_v6  ;;  %v1986_v13 = vcombine.low %v1953_v58, %v1969_v59  ;;  %v2012_v14 = vrot.slane %v1998_v51, %v3992_v28  ;;  %v1138_v18 = vshrl.u32 %v4104_v24, 16 }
 0x1e5   : > { %3354 = vmatprep.subr.bf16.mxu0 %v3710_v3  ;;  %v2028_v16 = vrot.slane %v2014_v53, %v3992_v28  ;;  %v1137_v17 = vpack.i.b16 %v4096_v15, %v4104_v24  ;;  %v1158_v19 = vpack.i.b16 %v1157_v31, %v1156_v25  ;;  %v4197_v20 = vpack.i.b16 %v2078_v11, %v2077_v10 }
 0x1e6   : > { %v1993_v21 = vrot.slane %v1986_v13, %v3996_v43  ;;  %v2065_v23 = vshrl.u32 %v4169_v6, 16  ;;  %v2066_v44 = vshrl.u32 %v4173_v7, 16  ;;  %v1409_v39 = vsel %vm1407_vm4, %v1155_v29, 0 }
 0x1e7   : > { %v2045_v22 = vcombine.low %v2012_v14, %v2028_v16  ;;  %v1140_v37 = vpack.i.b16 %v1139_v35, %v1138_v18  ;;  %v1455_v15 = vsel %vm1407_vm4, %v1158_v19, 0  ;;  %v1359_v50 = vadd.f32 %v3226_v49, %v4232_v42 }
 0x1e8   : > { %v4205_v51 = vpack.i.b16 %v2066_v44, %v2065_v23  ;;  %v1996_v53 = vcombine.high %v1993_v21, %v3725_v4  ;;  %v2083_v25 = vshrl.u32 %v1993_v21, 16  ;;  %v2188_v56 = vsel %vm1165_vm3, %v2076_v9, 0 }
 0x1e9   : > { %3339 = vmatmul.mubr.msk.bf16.vlgmr.msra.gmra.mrb[4].mxu1 %vm1165_vm3, %v1137_v17  ;;  %v2052_v47 = vrot.slane %v2045_v22, %v3996_v43  ;;  %v2234_v62 = vsel %vm1165_vm3, %v4197_v20, 0 }
 0x1ea   : > { %3349 = vmatpush3.bf16.msra.mxu1 %v1409_v39  ;;  %3350 = vmatprep.mubr.msk.bf16.mxu1 %vm3711_vm1, %v3710_v3  ;;  %v2089_v29 = vshrl.u32 %v1996_v53, 16 }
 0x1eb   : > { %3345 = vmatmul.mubr.msk.bf16.vlgmr.msra.gmra.mrb[8].mxu0 %vm1165_vm3, %v1140_v37  ;;  %3360 = vmatprep.subr.bf16.mxu1 %v3710_v3  ;;  %v2082_v24 = vpack.i.b16 %v2052_v47, %v1993_v21  ;;  %v2084_v26 = vshrl.u32 %v2052_v47, 16  ;;  %v2055_v27 = vcombine.high %v2052_v47, %v3725_v4 }
 0x1ec   : > { %3355 = vmatpush3.bf16.msra.mxu0 %v1455_v15  ;;  %3356 = vmatprep.mubr.msk.bf16.mxu0 %vm3711_vm1, %v3710_v3 }
 0x1ed   : > { %3366 = vmatprep.subr.bf16.mxu0 %v3710_v3  ;;  %v4218_v31 = vsel %vm1407_vm4, %v2082_v24, 0  ;;  %v2085_v33 = vpack.i.b16 %v2084_v26, %v2083_v25  ;;  %v2088_v35 = vpack.i.b16 %v2055_v27, %v1996_v53  ;;  %v2090_v36 = vshrl.u32 %v2055_v27, 16 }
 0x1ef   : > { %v4221_v45 = vsel %vm1407_vm4, %v2085_v33, 0  ;;  %v4224_v46 = vsel %vm1407_vm4, %v2088_v35, 0  ;;  %v2091_v4 = vpack.i.b16 %v2090_v36, %v2089_v29 }
 0x1f1   : > { %v4227_v40 = vsel %vm1407_vm4, %v2091_v4, 0 }
 0x2b4   : > { %v1206_v52 = vpop.f32.mrb[0].mxu1 }
 0x2b5   : > { %v1350_v54 = vmul.f32 0.35355338, %v1206_v52  ;;  %v3328_v58 = vpop.f32.mrb[1].mxu1 }
 0x2b6   : > { %v1209_v59 = vpop.f32.mrb[2].mxu1  ;;  %v1252_v61 = vpop.f32.mrb[4].mxu0 }
 0x2b7   : > { %v1351_v63 = vmul.f32 0.35355338, %v1252_v61  ;;  %v3329_v0 = vpop.f32.mrb[3].mxu1  ;;  %v3334_v34 = vpop.f32.mrb[5].mxu0  ;;  %v1360_v48 = vadd.f32 %v1359_v50, %v1350_v54 }
 0x2b8   : > { %v1255_v2 = vpop.f32.mrb[6].mxu0 }
 0x2b9   : > { %v3335_v10 = vpop.f32.mrb[7].mxu0  ;;  %v1364_v11 = vsel %vm1165_vm3, %v1360_v48, -inf  ;;  %v1361_v13 = vadd.f32 %v1359_v50, %v1351_v63  ;;  %v2142_v2 = vsel %vm1165_vm3, %v4177_v8, 0 }
 0x2ba   : > { %1365 = vmax.xlane.f32.xlu1 %v1364_v11  ;;  %v3237_v10 = vld [vmem:[%s4579_s2 + $0x1] ss:$0 sm:$0xff] }
 0x2bb   : > { %v1367_v14 = vsel %vm1165_vm3, %v1361_v13, -inf  ;;  %v2285_v11 = vadd.f32 %v3237_v10, %v4232_v42 }
 0x2bc   : > { %v1298_v16 = vpop.f32.mrb[4].mxu1  ;;  %1368 = vmax.xlane.f32.xlu0 %v1367_v14 }
 0x2bd   : > { %v1352_v17 = vmul.f32 0.35355338, %v1298_v16  ;;  %v3340_v18 = vpop.f32.mrb[5].mxu1 }
 0x2be   : > { %v1301_v19 = vpop.f32.mrb[6].mxu1  ;;  %v1344_v21 = vpop.f32.mrb[8].mxu0 }
 0x2bf   : > { %v1353_v22 = vmul.f32 0.35355338, %v1344_v21  ;;  %v3341_v23 = vpop.f32.mrb[7].mxu1  ;;  %v3346_v44 = vpop.f32.mrb[9].mxu0  ;;  %v1362_v39 = vadd.f32 %v1359_v50, %v1352_v17 }
 0x2c0   : > { %v1347_v37 = vpop.f32.mrb[10].mxu0 }
 0x2c1   : > { %v3347_v47 = vpop.f32.mrb[11].mxu0  ;;  %v1370_v53 = vsel %vm1165_vm3, %v1362_v39, -inf  ;;  %v1363_v15 = vadd.f32 %v1359_v50, %v1353_v22 }
 0x2c2   : > { %1371 = vmax.xlane.f32.xlu0 %v1370_v53 }
 0x2c3   : > { %v1373_v24 = vsel %vm1165_vm3, %v1363_v15, -inf }
 0x2c4   : > { %1374 = vmax.xlane.f32.xlu1 %v1373_v24 }
 0x347   : > { %v1366_v25 = vpop.xlane.xlu1 %1365 }
 0x348   : > { %v1376_v26 = vsub.f32 %v1360_v48, %v1366_v25 }
 0x349   : > { %v1369_v27 = vpop.xlane.xlu0 %1368 }
 0x34a   : > { %v1380_v29 = vmul.f32 1.442695, %v1376_v26  ;;  %v1377_v33 = vsub.f32 %v1361_v13, %v1369_v27 }
 0x34c   : > { %3555 = vpow2.f32 %v1380_v29  ;;  %v1382_v35 = vmul.f32 1.442695, %v1377_v33 }
 0x34e   : > { %3557 = vpow2.f32 %v1382_v35 }
 0x34f   : > { %v1372_v36 = vpop.xlane.xlu0 %1371 }
 0x350   : > { %v1378_v4 = vsub.f32 %v1362_v39, %v1372_v36 }
 0x351   : > { %v1375_v49 = vpop.xlane.xlu1 %1374 }
 0x352   : > { %v1384_v52 = vmul.f32 1.442695, %v1378_v4  ;;  %v1379_v54 = vsub.f32 %v1363_v15, %v1375_v49 }
 0x354   : > { %3559 = vpow2.f32 %v1384_v52  ;;  %v1386_v58 = vmul.f32 1.442695, %v1379_v54 }
 0x356   : > { %v4242_v50 = vpop.eup %3555  ;;  %3561 = vpow2.f32 %v1386_v58 }
 0x357   : > { %v1400_v59 = vpack.c.bf16 %v4242_v50, %v4242_v50  ;;  %v1388_v58 = vsel %vm1165_vm3, %v4242_v50, 0.0 }
 0x358   : > { %v4246_v61 = vpop.eup %3557 }
 0x359   : > { %3351 = vmatmul.mubr.msk.bf16.vlgmr.msra.gmra.mrb[8].mxu1 %vm1165_vm3, %v1400_v59  ;;  %v1401_v63 = vpack.c.bf16 %v4246_v61, %v4246_v61  ;;  %v1391_v59 = vsel %vm1165_vm3, %v4246_v61, 0.0 }
 0x35a   : > { %3361 = vmatpush3.bf16.msra.mxu1 %v4135_v60  ;;  %3362 = vmatprep.mubr.msk.bf16.mxu1 %vm3711_vm1, %v3710_v3 }
 0x35b   : > { %3357 = vmatmul.mubr.msk.bf16.vlgmr.msra.gmra.mrb[12].mxu0 %vm1165_vm3, %v1401_v63  ;;  %3372 = vmatprep.subr.bf16.mxu1 %v3710_v3 }
 0x35c   : > { %3367 = vmatpush3.bf16.msra.mxu0 %v4153_v38  ;;  %3368 = vmatprep.mubr.msk.bf16.mxu0 %vm3711_vm1, %v3710_v3  ;;  %v2096_v38 = vsel %vm1165_vm3, %v2070_v41, 0 }
 0x35d   : > { %3378 = vmatprep.subr.bf16.mxu0 %v3710_v3 }
 0x35e   : > { %v4260_v0 = vpop.eup %3559 }
 0x35f   : > { %v1402_v34 = vpack.c.bf16 %v4260_v0, %v4260_v0  ;;  %v1394_v63 = vsel %vm1165_vm3, %v4260_v0, 0.0 }
 0x360   : > { %v4264_v60 = vpop.eup %3561 }
 0x361   : > { %3363 = vmatmul.mubr.msk.bf16.vlgmr.msra.gmra.mrb[12].mxu1 %vm1165_vm3, %v1402_v34  ;;  %v1403_v48 = vpack.c.bf16 %v4264_v60, %v4264_v60  ;;  %v1397_v34 = vsel %vm1165_vm3, %v4264_v60, 0.0 }
 0x362   : > { %3374 = vmatprep.mubr.msk.bf16.mxu1 %vm3711_vm1, %v3710_v3 }
 0x363   : > { %3373 = vmatpush3.bf16.xpose.msra.mxu1 %v2096_v38  ;;  %3369 = vmatmul.mubr.msk.bf16.vlgmr.msra.gmra.mrb[16].mxu0 %vm1165_vm3, %v1403_v48 }
 0x364   : > { %3384 = vmatprep.subr.bf16.mxu1 %v3710_v3  ;;  %3380 = vmatprep.mubr.msk.bf16.mxu0 %vm3711_vm1, %v3710_v3 }
 0x365   : > { %3379 = vmatpush3.bf16.xpose.msra.mxu0 %v2142_v2 }
 0x366   : > { %3390 = vmatprep.subr.bf16.mxu0 %v3710_v3 }
 0x36a   : > { %3375 = vmatmul.mubr.msk.bf16.vlgmr.msra.gmra.mrb[16].mxu1 %vm1165_vm3, %v2058_v30 }
 0x36b   : > { %3385 = vmatpush3.bf16.xpose.msra.mxu1 %v2188_v56  ;;  %3386 = vmatprep.mubr.msk.bf16.mxu1 %vm3711_vm1, %v3710_v3 }
 0x36c   : > { %3381 = vmatmul.mubr.msk.bf16.vlgmr.msra.gmra.mrb[20].mxu0 %vm1165_vm3, %v4165_v5  ;;  %3396 = vmatprep.subr.bf16.mxu1 %v3710_v3 }
 0x36d   : > { %3391 = vmatpush3.bf16.xpose.msra.mxu0 %v2234_v62  ;;  %3392 = vmatprep.mubr.msk.bf16.mxu0 %vm3711_vm1, %v3710_v3 }
 0x36e   : > { %3402 = vmatprep.subr.bf16.mxu0 %v3710_v3 }
 0x372   : > { %3387 = vmatmul.mubr.msk.bf16.vlgmr.msra.gmra.mrb[20].mxu1 %vm1165_vm3, %v2064_v12 }
 0x373   : > { %3397 = vmatpush3.bf16.msra.mxu1 %v4218_v31  ;;  %3398 = vmatprep.mubr.msk.bf16.mxu1 %vm3711_vm1, %v3710_v3 }
 0x374   : > { %3393 = vmatmul.mubr.msk.bf16.vlgmr.msra.gmra.mrb[24].mxu0 %vm1165_vm3, %v4205_v51  ;;  %3408 = vmatprep.subr.bf16.mxu1 %v3710_v3 }
 0x375   : > { %3403 = vmatpush3.bf16.msra.mxu0 %v4221_v45  ;;  %3404 = vmatprep.mubr.msk.bf16.mxu0 %vm3711_vm1, %v3710_v3 }
 0x376   : > { %3414 = vmatprep.subr.bf16.mxu0 %v3710_v3 }
 0x42c   : > { %v4314_v55 = vpop.f32.mrb[8].mxu1 }
 0x42d   : > { %v3352_v57 = vpop.f32.mrb[9].mxu1 }
 0x42e   : > { %v1448_v30 = vpop.f32.mrb[10].mxu1  ;;  %v4316_v32 = vpop.f32.mrb[12].mxu0 }
 0x42f   : > { %v3353_v41 = vpop.f32.mrb[11].mxu1  ;;  %v3358_v1 = vpop.f32.mrb[13].mxu0 }
 0x430   : > { %v1494_v5 = vpop.f32.mrb[14].mxu0 }
 0x431   : > { %v3359_v6 = vpop.f32.mrb[15].mxu0 }
 0x434   : > { %v4318_v7 = vpop.f32.mrb[12].mxu1 }
 0x435   : > { %v3364_v8 = vpop.f32.mrb[13].mxu1 }
 0x436   : > { %v1540_v9 = vpop.f32.mrb[14].mxu1  ;;  %v4320_v12 = vpop.f32.mrb[16].mxu0 }
 0x437   : > { %v3365_v20 = vpop.f32.mrb[15].mxu1  ;;  %v3370_v51 = vpop.f32.mrb[17].mxu0 }
 0x438   : > { %v1586_v31 = vpop.f32.mrb[18].mxu0 }
 0x439   : > { %v3371_v45 = vpop.f32.mrb[19].mxu0 }
 0x43d   : > { %v2132_v13 = vpop.f32.mrb[16].mxu1 }
 0x43e   : > { %v2276_v14 = vmul.f32 0.35355338, %v2132_v13  ;;  %v3376_v16 = vpop.f32.mrb[17].mxu1 }
 0x43f   : > { %v2135_v17 = vpop.f32.mrb[18].mxu1  ;;  %v2178_v18 = vpop.f32.mrb[20].mxu0 }
 0x440   : > { %v2277_v19 = vmul.f32 0.35355338, %v2178_v18  ;;  %v3377_v21 = vpop.f32.mrb[19].mxu1  ;;  %v3382_v22 = vpop.f32.mrb[21].mxu0  ;;  %v2286_v23 = vadd.f32 %v2285_v11, %v2276_v14 }
 0x441   : > { %v2181_v44 = vpop.f32.mrb[22].mxu0 }
 0x442   : > { %v3383_v39 = vpop.f32.mrb[23].mxu0  ;;  %v2290_v37 = vsel %vm1165_vm3, %v2286_v23, -inf  ;;  %v2287_v47 = vadd.f32 %v2285_v11, %v2277_v19 }
 0x443   : > { %2291 = vmax.xlane.f32.xlu0 %v2290_v37 }
 0x444   : > { %v2293_v53 = vsel %vm1165_vm3, %v2287_v47, -inf }
 0x445   : > { %v2224_v15 = vpop.f32.mrb[20].mxu1  ;;  %2294 = vmax.xlane.f32.xlu1 %v2293_v53 }
 0x446   : > { %v2278_v42 = vmul.f32 0.35355338, %v2224_v15  ;;  %v3388_v24 = vpop.f32.mrb[21].mxu1 }
 0x447   : > { %v2227_v25 = vpop.f32.mrb[22].mxu1  ;;  %v2270_v26 = vpop.f32.mrb[24].mxu0 }
 0x448   : > { %v2279_v27 = vmul.f32 0.35355338, %v2270_v26  ;;  %v3389_v29 = vpop.f32.mrb[23].mxu1  ;;  %v3394_v33 = vpop.f32.mrb[25].mxu0  ;;  %v2288_v35 = vadd.f32 %v2285_v11, %v2278_v42 }
 0x449   : > { %v2273_v36 = vpop.f32.mrb[26].mxu0 }
 0x44a   : > { %v3395_v4 = vpop.f32.mrb[27].mxu0  ;;  %v2296_v49 = vsel %vm1165_vm3, %v2288_v35, -inf  ;;  %v2289_v52 = vadd.f32 %v2285_v11, %v2279_v27 }
 0x44b   : > { %2297 = vmax.xlane.f32.xlu0 %v2296_v49 }
 0x44c   : > { %v2299_v54 = vsel %vm1165_vm3, %v2289_v52, -inf }
 0x44d   : > { %2300 = vmax.xlane.f32.xlu1 %v2299_v54 }
 0x44f   : > { %1389 = vadd.xlane.f32.xlu0 %v1388_v58 }
 0x451   : > { %1392 = vadd.xlane.f32.xlu1 %v1391_v59 }
 0x453   : > { %1395 = vadd.xlane.f32.xlu0 %v1394_v63 }
 0x455   : > { %1398 = vadd.xlane.f32.xlu1 %v1397_v34 }
 0x4d0   : > { %v2292_v48 = vpop.xlane.xlu0 %2291 }
 0x4d1   : > { %v2302_v38 = vsub.f32 %v2286_v23, %v2292_v48 }
 0x4d2   : > { %v2295_v2 = vpop.xlane.xlu1 %2294 }
 0x4d3   : > { %v2306_v56 = vmul.f32 1.442695, %v2302_v38  ;;  %v2303_v62 = vsub.f32 %v2287_v47, %v2295_v2 }
 0x4d5   : > { %3563 = vpow2.f32 %v2306_v56  ;;  %v2308_v50 = vmul.f32 1.442695, %v2303_v62 }
 0x4d7   : > { %3565 = vpow2.f32 %v2308_v50 }
 0x4d8   : > { %v2298_v57 = vpop.xlane.xlu0 %2297 }
 0x4d9   : > { %v2304_v30 = vsub.f32 %v2288_v35, %v2298_v57 }
 0x4da   : > { %v2301_v61 = vpop.xlane.xlu1 %2300 }
 0x4db   : > { %v2310_v41 = vmul.f32 1.442695, %v2304_v30  ;;  %v2305_v1 = vsub.f32 %v2289_v52, %v2301_v61 }
 0x4dc   : > { %v1390_v5 = vpop.xlane.xlu0 %1389 }
 0x4dd   : > { %3567 = vpow2.f32 %v2310_v41  ;;  %v2312_v0 = vmul.f32 1.442695, %v2305_v1 }
 0x4de   : > { %3569 = vrcp.f32 %v1390_v5  ;;  %v1393_v6 = vpop.xlane.xlu1 %1392 }
 0x4df   : > { %v3564_v60 = vpop.eup %3563  ;;  %3571 = vpow2.f32 %v2312_v0 }
 0x4e0   : > { %3573 = vrcp.f32 %v1393_v6  ;;  %v1396_v8 = vpop.xlane.xlu0 %1395  ;;  %v2314_v9 = vsel %vm1165_vm3, %v3564_v60, 0.0  ;;  %v2326_v20 = vpack.c.bf16 %v3564_v60, %v3564_v60 }
 0x4e1   : > { %v3566_v51 = vpop.eup %3565  ;;  %3575 = vrcp.f32 %v1396_v8  ;;  %2315 = vadd.xlane.f32.xlu0 %v2314_v9 }
 0x4e2   : > { %3399 = vmatmul.mubr.msk.bf16.vlgmr.msra.gmra.mrb[24].mxu1 %vm1165_vm3, %v2326_v20  ;;  %v1399_v31 = vpop.xlane.xlu1 %1398  ;;  %v2317_v45 = vsel %vm1165_vm3, %v3566_v51, 0.0  ;;  %v2327_v10 = vpack.c.bf16 %v3566_v51, %v3566_v51 }
 0x4e3   : > { %3409 = vmatpush3.bf16.msra.mxu1 %v4224_v46  ;;  %3577 = vrcp.f32 %v1399_v31  ;;  %2318 = vadd.xlane.f32.xlu1 %v2317_v45 }
 0x4e4   : > { %3405 = vmatmul.mubr.msk.bf16.vlgmr.msra.gmra.mrb[28].mxu0 %vm1165_vm3, %v2327_v10  ;;  %3410 = vmatprep.mubr.msk.bf16.mxu1 %vm3711_vm1, %v3710_v3 }
 0x4e5   : > { %3415 = vmatpush3.bf16.msra.mxu0 %v4227_v40  ;;  %3416 = vmatprep.mubr.msk.bf16.mxu0 %vm3711_vm1, %v3710_v3 }
 0x4e6   : > { %3420 = vmatprep.subr.bf16.mxu1 %v3710_v3  ;;  %3428 = vmatprep.subr.bf16.mxu0 %v3710_v3 }
 0x4e7   : > { %v3568_v11 = vpop.eup %3567 }
 0x4e8   : > { %v3570_v13 = vpop.eup %3569  ;;  %v2320_v46 = vsel %vm1165_vm3, %v3568_v11, 0.0  ;;  %v2328_v14 = vpack.c.bf16 %v3568_v11, %v3568_v11 }
 0x4e9   : > { %v3572_v16 = vpop.eup %3571  ;;  %2321 = vadd.xlane.f32.xlu0 %v2320_v46  ;;  %v1590_v21 = vmul.f32 %v3570_v13, %v4314_v55 }
 0x4ea   : > { %v3574_v17 = vpop.eup %3573  ;;  %3411 = vmatmul.mubr.msk.bf16.vlgmr.msra.gmra.mrb[28].mxu1 %vm1165_vm3, %v2328_v14  ;;  %v2323_v18 = vsel %vm1165_vm3, %v3572_v16, 0.0  ;;  %v2329_v40 = vpack.c.bf16 %v3572_v16, %v3572_v16 }
 0x4eb   : > { %v3576_v19 = vpop.eup %3575  ;;  %2324 = vadd.xlane.f32.xlu1 %v2323_v18  ;;  %3424 = vmatprep.mubr.msk.bf16.mxu1 %vm3711_vm1, %v3710_v3  ;;  %v1592_v44 = vmul.f32 %v3574_v17, %v4316_v32 }
 0x4ec   : > { %v1594_v22 = vmul.f32 %v3576_v19, %v4318_v7  ;;  %3417 = vmatmul.mubr.msk.bf16.vlgmr.msra.gmra.mrb[32].mxu0 %vm1165_vm3, %v2329_v40 }
 0x4ed   : > { %v3578_v23 = vpop.eup %3577  ;;  %3432 = vmatprep.mubr.msk.bf16.mxu0 %vm3711_vm1, %v3710_v3 }
 0x4ee   : > { %v1597_v39 = vcombine.low %v1590_v21, %v1594_v22  ;;  %v1598_v37 = vcombine.high %v1590_v21, %v1594_v22  ;;  %v1596_v47 = vmul.f32 %v3578_v23, %v4320_v12 }
 0x4f0   : > { %v1613_v53 = vcombine.low %v1592_v44, %v1596_v47  ;;  %v1614_v15 = vcombine.high %v1592_v44, %v1596_v47  ;;  %v1605_v42 = vrot.slane %v1597_v39, %v3992_v28  ;;  %v1612_v55 = vrot.slane %v1598_v37, %v3992_v28 }
 0x4f2   : > { %v1621_v7 = vrot.slane %v1613_v53, %v3992_v28  ;;  %v1628_v24 = vrot.slane %v1614_v15, %v3992_v28 }
 0x4f4   : > { %v1629_v25 = vcombine.low %v1605_v42, %v1621_v7  ;;  %v1630_v26 = vcombine.high %v1605_v42, %v1621_v7  ;;  %v1645_v27 = vcombine.low %v1612_v55, %v1628_v24  ;;  %v1646_v29 = vcombine.high %v1612_v55, %v1628_v24 }
 0x4f6   : > { %v1637_v32 = vrot.slane %v1629_v25, %v3996_v43  ;;  %v1644_v33 = vrot.slane %v1630_v26, %v3996_v43  ;;  %v1653_v12 = vrot.slane %v1645_v27, %v3996_v43  ;;  %v1660_v35 = vrot.slane %v1646_v29, %v3996_v43 }
 0x4f8   : > { %v1665_v36 = vcombine.low %v1637_v32, %v1644_v33  ;;  %v3231_v4 = vcombine.high %v1637_v32, %v1644_v33  ;;  %v1681_v49 = vcombine.low %v1653_v12, %v1660_v35  ;;  %v3232_v52 = vcombine.high %v1653_v12, %v1660_v35 }
 0x4fa   : > { %v1672_v54 = vrot.slane %v1665_v36, %v3992_v28  ;;  %v1680_v58 = vrot.slane %v3231_v4, %v3992_v28  ;;  %v1688_v59 = vrot.slane %v1681_v49, %v3992_v28  ;;  %v1696_v63 = vrot.slane %v3232_v52, %v3992_v28 }
 0x4fc   : > { %v1698_v34 = vcombine.high %v1672_v54, %v1680_v58  ;;  %v1714_v48 = vcombine.high %v1688_v59, %v1696_v63  ;;  %v1697_v38 = vcombine.low %v1672_v54, %v1680_v58  ;;  %v1713_v2 = vcombine.low %v1688_v59, %v1696_v63  ;;  %v3547_v63 = vld [vmem:[%s3932_s27] sm:$0xff]  }
 0x4fd   : > { %3421 = vmatpush3.bf16.msra.mxu1 %v3547_v63  ;;  %v3552_v63 = vld [vmem:[%s3951_s25 + $0x8] sm:$0xff]  }
 0x4fe   : > { %v4375_v56 = vrot.slane %v1698_v34, %v3996_v43  ;;  %v4378_v62 = vrot.slane %v1714_v48, %v3996_v43  ;;  %v4381_v50 = vrot.slane %v1697_v38, %v3996_v43  ;;  %v4384_v57 = vrot.slane %v1713_v2, %v3996_v43  ;;  %3422 = vmatprep.subr.bf16.mxu1 %v3710_v3 }
 0x500   : > { %v1731_v30 = vcombine.low %v4375_v56, %v4378_v62  ;;  %v1729_v61 = vcombine.low %v4381_v50, %v4384_v57  ;;  %v1730_v41 = vcombine.high %v4381_v50, %v4384_v57  ;;  %v1732_v1 = vcombine.high %v4375_v56, %v4378_v62  ;;  %v3244_v50 = vld [vmem:[%s4580_s21] ss:$0 sm:$0xff] }
 0x56e   : > { %v2316_v5 = vpop.xlane.xlu0 %2315 }
 0x56f   : > { %3579 = vrcp.f32 %v2316_v5 }
 0x570   : > { %v2319_v0 = vpop.xlane.xlu1 %2318 }
 0x576   : > { %v2322_v6 = vpop.xlane.xlu0 %2321 }
 0x577   : > { %3581 = vrcp.f32 %v2322_v6 }
 0x578   : > { %v2325_v60 = vpop.xlane.xlu1 %2324  ;;  %3583 = vrcp.f32 %v2319_v0 }
 0x579   : > { %3585 = vrcp.f32 %v2325_v60  ;;  %v3580_v13 = vpop.eup %3579 }
 0x581   : > { %v3582_v46 = vpop.eup %3581 }
 0x582   : > { %v3584_v16 = vpop.eup %3583 }
 0x583   : > { %v3586_v19 = vpop.eup %3585 }
 0x5b5   : > { %v2370_v8 = vpop.f32.mrb[24].mxu1 }
 0x5b6   : > { %v3400_v9 = vpop.f32.mrb[25].mxu1  ;;  %v2515_v17 = vmul.f32 %v3580_v13, %v2370_v8 }
 0x5b7   : > { %v2373_v20 = vpop.f32.mrb[26].mxu1  ;;  %v2416_v51 = vpop.f32.mrb[28].mxu0 }
 0x5b8   : > { %v3401_v31 = vpop.f32.mrb[27].mxu1  ;;  %v3406_v45 = vpop.f32.mrb[29].mxu0  ;;  %v2517_v23 = vmul.f32 %v3584_v16, %v2416_v51 }
 0x5b9   : > { %v2419_v10 = vpop.f32.mrb[30].mxu0  ;;  %v3548_v31 = vld [vmem:[%s3932_s27 + $0x8] sm:$0xff]   ;;  %s3726_s27 = smov 16  }
 0x5ba   : > { %v3407_v11 = vpop.f32.mrb[31].mxu0  ;;  %3423 = vmatpush3.bf16.msra.mxu1 %v3548_v31  ;;  %v3249_v31 = vld [vmem:[%s725_s7] ss:$0 sm:$0xff] }
 0x5bb   : > { %3436 = vmatprep.subr.bf16.mxu1 %v3710_v3 }
 0x5bd   : > { %v2462_v14 = vpop.f32.mrb[28].mxu1 }
 0x5be   : > { %v2519_v18 = vmul.f32 %v3582_v46, %v2462_v14  ;;  %v3412_v40 = vpop.f32.mrb[29].mxu1 }
 0x5bf   : > { %v2465_v21 = vpop.f32.mrb[30].mxu1  ;;  %v2508_v22 = vpop.f32.mrb[32].mxu0 }
 0x5c0   : > { %v2522_v44 = vcombine.low %v2515_v17, %v2519_v18  ;;  %v2523_v39 = vcombine.high %v2515_v17, %v2519_v18  ;;  %v2521_v37 = vmul.f32 %v3586_v19, %v2508_v22  ;;  %v3413_v47 = vpop.f32.mrb[31].mxu1  ;;  %v3418_v53 = vpop.f32.mrb[33].mxu0 }
 0x5c1   : > { %v2511_v15 = vpop.f32.mrb[34].mxu0 }
 0x5c2   : > { %v2538_v42 = vcombine.low %v2517_v23, %v2521_v37  ;;  %v2539_v55 = vcombine.high %v2517_v23, %v2521_v37  ;;  %v3419_v7 = vpop.f32.mrb[35].mxu0  ;;  %v2530_v24 = vrot.slane %v2522_v44, %v3992_v28  ;;  %v2537_v25 = vrot.slane %v2523_v39, %v3992_v28 }
 0x5c4   : > { %v2546_v26 = vrot.slane %v2538_v42, %v3992_v28  ;;  %v2553_v27 = vrot.slane %v2539_v55, %v3992_v28  ;;  %v3595_v42 = vld [vmem:[#allocation5] sm:$0xff] }
 0x5c6   : > { %v2554_v29 = vcombine.low %v2530_v24, %v2546_v26  ;;  %v2555_v32 = vcombine.high %v2530_v24, %v2546_v26  ;;  %v2570_v33 = vcombine.low %v2537_v25, %v2553_v27  ;;  %v2571_v12 = vcombine.high %v2537_v25, %v2553_v27  ;;  %v3596_v24 = vld [vmem:[#allocation5 + $0x8] sm:$0xff] }
 0x5c8   : > { %v2562_v35 = vrot.slane %v2554_v29, %v3996_v43  ;;  %v2569_v36 = vrot.slane %v2555_v32, %v3996_v43  ;;  %v2578_v4 = vrot.slane %v2570_v33, %v3996_v43  ;;  %v2585_v49 = vrot.slane %v2571_v12, %v3996_v43 }
 0x5ca   : > { %v2590_v52 = vcombine.low %v2562_v35, %v2569_v36  ;;  %v3242_v54 = vcombine.high %v2562_v35, %v2569_v36  ;;  %v2606_v58 = vcombine.low %v2578_v4, %v2585_v49  ;;  %v3243_v59 = vcombine.high %v2578_v4, %v2585_v49 }
 0x5cc   : > { %v2597_v34 = vrot.slane %v2590_v52, %v3992_v28  ;;  %v2605_v48 = vrot.slane %v3242_v54, %v3992_v28  ;;  %v2613_v38 = vrot.slane %v2606_v58, %v3992_v28  ;;  %v2621_v2 = vrot.slane %v3243_v59, %v3992_v28  ;;  %v3549_v54 = vld [vmem:[%s3941_s23] sm:$0xff]   ;;  %v3550_v58 = vld [vmem:[%s3941_s23 + $0x8] sm:$0xff]  }
 0x5cd   : > { %3429 = vmatpush3.bf16.msra.mxu0 %v3549_v54  ;;  %v3551_v59 = vld [vmem:[%s3951_s25] sm:$0xff]  }
 0x5ce   : > { %v2623_v5 = vcombine.high %v2597_v34, %v2605_v48  ;;  %v2639_v0 = vcombine.high %v2613_v38, %v2621_v2  ;;  %v2622_v6 = vcombine.low %v2597_v34, %v2605_v48  ;;  %v2638_v60 = vcombine.low %v2613_v38, %v2621_v2  ;;  %3430 = vmatprep.subr.bf16.mxu0 %v3710_v3  ;;  %v3261_v54 = vld [vmem:[%s3911_s18] ss:$0 sm:$0xff] }
 0x5d0   : > { %v2637_v8 = vrot.slane %v2623_v5, %v3996_v43  ;;  %v2653_v9 = vrot.slane %v2639_v0, %v3996_v43  ;;  %v2630_v20 = vrot.slane %v2622_v6, %v3996_v43  ;;  %v2646_v51 = vrot.slane %v2638_v60, %v3996_v43 }
 0x5d1   : > { %3431 = vmatpush3.bf16.msra.mxu0 %v3550_v58 }
 0x5d2   : > { %v2656_v45 = vcombine.low %v2637_v8, %v2653_v9  ;;  %v2655_v10 = vcombine.high %v2630_v20, %v2646_v51  ;;  %v2654_v11 = vcombine.low %v2630_v20, %v2646_v51  ;;  %v2657_v28 = vcombine.high %v2637_v8, %v2653_v9  ;;  %v3248_v8 = vld [vmem:[%s722_s19] ss:$0 sm:$0xff] }
 0x5d4   : > { %v3535_v13 = vpack.i.bf16 %v2656_v45, %v1731_v30  ;;  %v3530_v46 = vpack.i.bf16 %v2655_v10, %v1730_v41  ;;  %v3540_v43 = vpack.i.bf16 %v2657_v28, %v1732_v1 }
 0x5d6   : > { %3536 = vrot.lane.b32.xlu1 %v3535_v13, %s3726_s27  ;;  %3531 = vrot.lane.b32.xlu0 %v3530_v46, %s3727_s3  ;;  %v3553_v13 = vld [vmem:[%s3951_s25 + $0x10] sm:$0xff]   ;;  %v3554_v46 = vld [vmem:[%s3951_s25 + $0x18] sm:$0xff]   ;;  %s3729_s27 = smov [#allocation5]  }
 0x5da   : > { %3541 = vrot.lane.b32.xlu1 %v3540_v43, %s3728_s16  ;;  %v3250_v43 = vld [vmem:[%s4581_s20] ss:$0 sm:$0xff]  ;;  %s3000_s16 = sshll.u32 %s3729_s27, 4  ;;  %s3001_s16 = int_to_ptr.vmem [resolvable:$true] %s3000_s16 }
 0x5db   : > { %s3627_s24 = scalar_lea.vmem %s3001_s16, 256  ;;  %p3634_p12 = scmp.lt.s32.totalorder %s3001_s16, %s3001_s16 }
 0x5dc   : > { %p3628_p11 = scmp.ne.s32.totalorder %s3001_s16, %s3627_s24  ;;  %p3635_p0 = scmp.lt.s32.totalorder %s3627_s24, %s3627_s24 }
 0x5de   : > { %p3636_p2 = por %p3635_p0, %p3634_p12 }
 0x648   : > { %v3537_v14 = vpop.permute.xlu1 %3536  ;;  %v3532_v16 = vpop.permute.xlu0 %3531 }
 0x649   : > { %v3534_v17 = vunpack.i.h.bf16 %v3532_v16  ;;  %v3533_v18 = vunpack.i.l.bf16 %v3532_v16  ;;  %v3539_v30 = vunpack.i.h.bf16 %v3537_v14  ;;  %v3538_v40 = vunpack.i.l.bf16 %v3537_v14 }
 0x64b   : > { %v1745_v56 = vsel %vm1165_vm3, %v1729_v61, %v3533_v18  ;;  %v2670_v62 = vsel %vm1165_vm3, %v2654_v11, %v3534_v17 }
 0x64c   : > { %v3542_v41 = vpop.permute.xlu1 %3541  ;;  %v1747_v21 = vsel %vm1746_vm5, %v1745_v56, %v3538_v40  ;;  %v2671_v22 = vsel %vm1746_vm5, %v2670_v62, %v3539_v30 }
 0x64d   : > { %v3544_v1 = vunpack.i.h.bf16 %v3542_v41  ;;  %v3543_v19 = vunpack.i.l.bf16 %v3542_v41 }
 0x64f   : > { %v1749_v23 = vsel %vm1748_vm6, %v1747_v21, %v3543_v19  ;;  %v2672_v44 = vsel %vm1748_vm6, %v2671_v22, %v3544_v1 }
 0x650   : > { %v2673_v39 = vpack.c.bf16 %v2672_v44, %v1749_v23 }
 0x652   : > { %3425 = vmatmul.mubr.msk.bf16.vlgmr.msra.gmra.mrb[32].mxu1 %vm766_vm2, %v2673_v39 }
 0x653   : > { %3444 = vmatprep.mubr.msk.bf16.mxu1 %vm3711_vm1, %v3710_v3  ;;  %3437 = vmatpush3.bf16.msra.mxu1 %v3551_v59 }
 0x654   : > { %3438 = vmatprep.subr.bf16.mxu1 %v3710_v3 }
 0x657   : > { %3439 = vmatpush3.bf16.msra.mxu1 %v3552_v63 }
 0x658   : > { %3440 = vmatprep.subr.bf16.mxu1 %v3710_v3 }
 0x65b   : > { %3441 = vmatpush3.bf16.msra.mxu1 %v3553_v13 }
 0x65c   : > { %3442 = vmatprep.subr.bf16.mxu1 %v3710_v3  ;;  %v3254_v3 = vld [vmem:[%s719_s14] ss:$0 sm:$0xff]  ;;  %s4582_s14 = sld [smem:[#allocation11_spill]] }
 0x65f   : > { %3443 = vmatpush3.bf16.msra.mxu1 %v3554_v46 }
 0x662   : > { %s4583_s5 = sadd.s32 4294967295, %s4582_s14  }
 0x663   : > { %p4484_p9 = scmp.eq.s32.totalorder %s4583_s5, 1 }
 0x665   : > { %p3629_p6 = pnand %p3628_p11, %p4484_p9 }
 0x667   : > { %p3630_p8 = pneg %p3629_p6 }
 0x669   : > { %p3637_p3 = pnand %p3636_p2, %p3630_p8 }
 0x725   : > { %v2734_v57 = vpop.f32.mrb[32].mxu1 }
 0x726   : > { %v2735_v61 = vadd.f32 %v3244_v50, %v2734_v57  ;;  %v3426_v37 = vpop.f32.mrb[33].mxu1 }
 0x727   : > { %v2737_v47 = vpop.f32.mrb[34].mxu1 }
 0x728   : > { %v2738_v53 = vadd.f32 %v3244_v50, %v2737_v47  ;;  %v3427_v15 = vpop.f32.mrb[35].mxu1  ;;  %v2741_v55 = vadd.f32 %v3595_v42, %v2735_v61 }
 0x72a   : > { %v2743_v7 = vsel %vm766_vm2, %v2741_v55, 0.0  ;;  %v2742_v25 = vadd.f32 %v3596_v24, %v2738_v53 }
 0x72b   : > { %2744 = vadd.xlane.f32.xlu0 %v2743_v7 }
 0x72c   : > { %v2746_v26 = vsel %vm766_vm2, %v2742_v25, 0.0 }
 0x72d   : > { %2747 = vadd.xlane.f32.xlu1 %v2746_v26 }
 0x7b8   : > { %v2745_v27 = vpop.xlane.xlu0 %2744 }
 0x7b9   : > { %v2750_v29 = vmul.f32 0.03125, %v2745_v27 }
 0x7ba   : > { %v2748_v32 = vpop.xlane.xlu1 %2747 }
 0x7bb   : > { %v2752_v33 = vsub.f32 %v2741_v55, %v2750_v29  ;;  %v2751_v12 = vmul.f32 0.03125, %v2748_v32 }
 0x7bd   : > { %v2753_v35 = vsub.f32 %v2742_v25, %v2751_v12  ;;  %v2754_v36 = vmul.f32 %v2752_v33, %v2752_v33 }
 0x7bf   : > { %v2756_v4 = vsel %vm766_vm2, %v2754_v36, 0.0  ;;  %v2755_v49 = vmul.f32 %v2753_v35, %v2753_v35 }
 0x7c0   : > { %2757 = vadd.xlane.f32.xlu0 %v2756_v4  ;;  %v3260_v4 = vld [vmem:[%s728_s29] ss:$0 sm:$0xff] }
 0x7c1   : > { %v2759_v52 = vsel %vm766_vm2, %v2755_v49, 0.0 }
 0x7c4   : > { %2760 = vadd.xlane.f32.xlu0 %v2759_v52 }
 0x84d   : > { %v2758_v34 = vpop.xlane.xlu0 %2757 }
 0x84e   : > { %v2762_v48 = vmul.f32 0.03125, %v2758_v34 }
 0x850   : > { %v2764_v38 = vadd.f32 1e-05, %v2762_v48 }
 0x851   : > { %v2761_v2 = vpop.xlane.xlu0 %2760 }
 0x852   : > { %3587 = vrsqrt.f32 %v2764_v38  ;;  %v2763_v5 = vmul.f32 0.03125, %v2761_v2 }
 0x854   : > { %v2765_v0 = vadd.f32 1e-05, %v2763_v5 }
 0x856   : > { %3589 = vrsqrt.f32 %v2765_v0 }
 0x85c   : > { %v3588_v6 = vpop.eup %3587 }
 0x85d   : > { %v2768_v60 = vmul.f32 %v3588_v6, %v2752_v33 }
 0x85f   : > { %v2777_v20 = vmul.f32 %v3248_v8, %v2768_v60 }
 0x860   : > { %v3590_v9 = vpop.eup %3589 }
 0x861   : > { %v2769_v51 = vmul.f32 %v3590_v9, %v2753_v35  ;;  %v2786_v10 = vadd.f32 %v3249_v31, %v2777_v20 }
 0x863   : > { %v2778_v45 = vmul.f32 %v3248_v8, %v2769_v51 }
 0x865   : > { %v2787_v11 = vadd.f32 %v3249_v31, %v2778_v45 }
 0x867   : > { %v2788_v28 = vpack.c.bf16 %v2787_v11, %v2786_v10 }
 0x869   : > { %3433 = vmatmul.mubr.msk.bf16.vlgmr.msra.gmra.mrb[36].mxu0 %vm766_vm2, %v2788_v28 }
 0x93c   : > { %v2849_v14 = vpop.f32.mrb[36].mxu0 }
 0x93d   : > { %v2850_v16 = vadd.f32 %v3250_v43, %v2849_v14  ;;  %v3434_v17 = vpop.f32.mrb[37].mxu0 }
 0x93e   : > { %v2852_v18 = vpop.f32.mrb[38].mxu0 }
 0x93f   : > { %v2853_v30 = vadd.f32 %v3250_v43, %v2852_v18  ;;  %v3435_v40 = vpop.f32.mrb[39].mxu0  ;;  %v2856_v56 = vmax.f32 %v2850_v16, 0.0 }
 0x941   : > { %v2857_v62 = vmax.f32 %v2853_v30, 0.0 }
 0x943   : > { %v2858_v41 = vpack.c.bf16 %v2857_v62, %v2856_v56 }
 0x945   : > { %3445 = vmatmul.mubr.msk.bf16.vlgmr.msra.gmra.mrb[36].mxu1 %vm2898_vm7, %v2858_v41 }
 0xa18   : > { %v2936_v1 = vpop.f32.mrb[36].mxu1 }
 0xa19   : > { %v2937_v19 = vadd.f32 %v3254_v3, %v2936_v1  ;;  %v3446_v21 = vpop.f32.mrb[37].mxu1 }
 0xa1a   : > { %v2939_v22 = vpop.f32.mrb[38].mxu1 }
 0xa1b   : > { %v2940_v23 = vadd.f32 %v3254_v3, %v2939_v22  ;;  %v3447_v44 = vpop.f32.mrb[39].mxu1  ;;  %v2943_v39 = vadd.f32 %v2937_v19, %v2786_v10 }
 0xa1d   : > { %v2945_v50 = vsel %vm766_vm2, %v2943_v39, 0.0  ;;  %v2944_v57 = vadd.f32 %v2940_v23, %v2787_v11 }
 0xa1e   : > { %2946 = vadd.xlane.f32.xlu1 %v2945_v50 }
 0xa1f   : > { %v2948_v61 = vsel %vm766_vm2, %v2944_v57, 0.0 }
 0xa20   : > { %2949 = vadd.xlane.f32.xlu0 %v2948_v61 }
 0xaab   : > { %v2947_v37 = vpop.xlane.xlu1 %2946 }
 0xaac   : > { %v2951_v47 = vmul.f32 0.03125, %v2947_v37 }
 0xaad   : > { %v2950_v53 = vpop.xlane.xlu0 %2949 }
 0xaae   : > { %v2953_v15 = vsub.f32 %v2943_v39, %v2951_v47  ;;  %v2952_v42 = vmul.f32 0.03125, %v2950_v53 }
 0xab0   : > { %v2954_v55 = vsub.f32 %v2944_v57, %v2952_v42  ;;  %v2955_v7 = vmul.f32 %v2953_v15, %v2953_v15 }
 0xab2   : > { %v2957_v24 = vsel %vm766_vm2, %v2955_v7, 0.0  ;;  %v2956_v25 = vmul.f32 %v2954_v55, %v2954_v55 }
 0xab3   : > { %2958 = vadd.xlane.f32.xlu1 %v2957_v24 }
 0xab4   : > { %v2960_v26 = vsel %vm766_vm2, %v2956_v25, 0.0 }
 0xab5   : > { %2961 = vadd.xlane.f32.xlu0 %v2960_v26 }
 0xb40   : > { %v2959_v27 = vpop.xlane.xlu1 %2958 }
 0xb41   : > { %v2963_v29 = vmul.f32 0.03125, %v2959_v27 }
 0xb42   : > { %v2962_v32 = vpop.xlane.xlu0 %2961 }
 0xb43   : > { %v2965_v33 = vadd.f32 1e-05, %v2963_v29  ;;  %v2964_v12 = vmul.f32 0.03125, %v2962_v32 }
 0xb45   : > { %3591 = vrsqrt.f32 %v2965_v33  ;;  %v2966_v35 = vadd.f32 1e-05, %v2964_v12 }
 0xb47   : > { %3593 = vrsqrt.f32 %v2966_v35 }
 0xb4f   : > { %v3592_v36 = vpop.eup %3591 }
 0xb50   : > { %v2969_v49 = vmul.f32 %v3592_v36, %v2953_v15 }
 0xb51   : > { %v3594_v52 = vpop.eup %3593 }
 0xb52   : > { %v2978_v58 = vmul.f32 %v3260_v4, %v2969_v49  ;;  %v2970_v59 = vmul.f32 %v3594_v52, %v2954_v55 }
 0xb54   : > { %v2979_v63 = vmul.f32 %v3260_v4, %v2970_v59  ;;  %v2987_v34 = vadd.f32 %v3261_v54, %v2978_v58 }
 0xb56   : > { %v2988_v48 = vadd.f32 %v3261_v54, %v2979_v63  ;;  %2989 = vst.msk [vmem:[#allocation5] sm:$0xff] %vm766_vm2, %v2987_v34 }
 0xb58   : > { %2990 = vst.msk [vmem:[#allocation5 + $0x8] sm:$0xff] %vm766_vm2, %v2988_v48 }
 0xb59   : > { %3640 = shalt.err (!%p3637_p3)
}
 0xb5a   : > { %s4585_s21 = sld [smem:[#allocation20_spill]] }
 0xb60   : > { %s4586_s30 = smov %s4585_s21  ;;  %s3641_s23 = scalar_lea.hbm %s4585_s21, 256 }
 0xb61   : > { %p3642_p4 = scmp.ne.s32.totalorder %s4586_s30, %s3641_s23  ;;  %p3647_p13 = scmp.lt.u32.totalorder %s3641_s23, %s4586_s30 }
 0xb63   : > { %p3643_p1 = pnand %p3642_p4, %p4484_p9 }
 0xb65   : > { %p3644_p5 = pneg %p3643_p1 }
 0xb67   : > { %p3649_p10 = pnand %p3647_p13, %p3644_p5 }
 0xb69   : > { %3652 = shalt.err (!%p3649_p10)
}
 0xb6a   : > { %s3730_s20 = smov 128  }
 0xb6b   : > { %3451 = dma.vmem_to_hbm [thread:$0]  (%p4484_p9), %s3001_s16, 256, %s4586_s30, [#allocation4], %s3730_s20, %s3730_s20, %s3727_s3  }
 0xb6c   : > { %3682 = dma.done.wait (%p4484_p9), [#allocation4], 256  }
 0xb6d   : > { %3684 = vsyncadd (%p4484_p9), [#allocation4], 4294967040 }
 0xb6e PF: > { %s4587_s14 = sld [smem:[#allocation11_spill]]  ;;  %s4588_s18 = sld [smem:[#allocation8_spill]] }
 0xb6f   : > { %s4589_s19 = sld [smem:[#allocation9_spill]]  ;;  %s4590_s20 = sld [smem:[#allocation13_spill]] }
 0xb70   : > { %s4591_s21 = sld [smem:[#allocation10_spill]]  ;;  %s4592_s22 = sld [smem:[#allocation12_spill]] }
 0xb74   : > { %s29_s23 = sadd.s32 1, %s4587_s14  }
 0xb75   : > { %p26_p7 = scmp.ge.s32.totalorder %s29_s23, 4  }
 0xb77   :  { %28 = sbr.rel (!%p26_p7) target bundleno = 13 (0xd), region = 161 }
 0xb7e   :  { %3016 = vsyncpa [#allocation3], 1 }
 0xb7f   :  { %3018 = vsyncpa [#allocation3 + $0x1], 1 }
 0xb80   :  { %3019 = vsyncpa [#allocation4], 1 }
 0xb81   :  { %3021 = vsyncpa [#allocation4 + $0x1], 1 }

</bundles_post_ra>
